<compile_context>
chip_gen: v6e
topology: v6e:2x2x1
jax: 0.10.0
libtpu: 0.0.40
codegen_flags: <defaults>
</compile_context>

<pallas_src>
import numpy as np

import jax
import jax.numpy as jnp
from jax.experimental import pallas as pl
from jax.experimental.pallas import tpu as pltpu


# Padded columns 3*wo .. 3*wo+4 of the circular left-pad-by-2 map to these
# original month indices (padded col pc -> month (pc - 2) mod 12).
_WINDOW_MONTHS = ((10, 11, 0, 1, 2), (1, 2, 3, 4, 5), (4, 5, 6, 7, 8), (7, 8, 9, 10, 11))

_GN_COUNT = 230.0 * 4.0          # GroupNorm(1, 230) element count per sample


# ---------------------------------------------------------------------------
# Fused forward kernel
# ---------------------------------------------------------------------------

def _dlmodel_kernel(x_ref, ab_ref, w1_ref, aff1_ref, w2_ref, aff2_ref,
                    wct_ref, aff4_ref, pcaw_ref, pcab_ref, pca_ref, prob_ref):
    B = x_ref.shape[0]

    # ---- MyActivationLayer: all 18 variant rows (both conv groups) at once,
    # months on sublanes / variants on lanes; one affine, one tanh.
    xr = x_ref[...]                              # (B, 12, 3) [low, precip, high]
    low = xr[:, :, 0:1]
    prc = xr[:, :, 1:2]
    high = xr[:, :, 2:3]
    logp = jnp.log(prc + 1.0)                    # matches torch.log(precip + 1)

    raw18 = jnp.concatenate([low, prc, high] * 3 + [low, logp, high] * 3,
                            axis=2)              # (B, 12, 18)
    act = jnp.tanh(raw18 * ab_ref[0] + ab_ref[1])  # (B, 12, 18)

    # ---- im2col: the 4 output columns use disjoint 5-month windows of the
    # circularly padded input, so the stage-1 LHS is (4B, 90) with lanes
    # ordered (window offset jj, variant v);  row = wo*B + b.
    win_rows = []
    for wo in range(4):
        cols = [act[:, m, :] for m in _WINDOW_MONTHS[wo]]   # 5 x (B, 18)
        win_rows.append(jnp.concatenate(cols, axis=1))      # (B, 90)
    lhs1 = jnp.concatenate(win_rows, axis=0)                # (4B, 90)

    # ---- stage 1 (MXU): grouped_conv1 patch (672 lanes, already in the
    # r*96 + kw*32 + c order stage 2 wants) + grouped_conv3 (6 lanes);
    # eval BatchNorm1 + ReLU fused on the 672 conv lanes only.
    z1 = jnp.dot(lhs1, w1_ref[...], preferred_element_type=jnp.float32)   # (4B, 678)
    z1 = z1 * aff1_ref[0] + aff1_ref[1]
    relu1 = jax.lax.broadcasted_iota(jnp.int32, z1.shape, 1) < 672
    z1 = jnp.where(relu1, jnp.maximum(z1, 0.0), z1)

    # ---- stage 2 (MXU): conv1(32) + conv2(96) + grouped_conv2(96) +
    # gconv3 pass-through(6) -> 230 channels, lane-padded to 256;
    # eval BN2/BN3 + ReLU on lanes < 128 only.
    z2 = jnp.dot(z1, w2_ref[...], preferred_element_type=jnp.float32)     # (4B, 256)
    z2 = z2 * aff2_ref[0] + aff2_ref[1]
    relu2 = jax.lax.broadcasted_iota(jnp.int32, z2.shape, 1) < 128
    z2 = jnp.where(relu2, jnp.maximum(z2, 0.0), z2)

    # ---- GroupNorm(num_groups=1, num_channels=230) per sample over the 4
    # positions (pad lanes are exactly zero, so plain sums are correct).
    sq = z2 * z2
    zb = z2[0:B] + z2[B:2 * B] + z2[2 * B:3 * B] + z2[3 * B:4 * B]        # (B, 256)
    qb = sq[0:B] + sq[B:2 * B] + sq[2 * B:3 * B] + sq[3 * B:4 * B]
    inv_n = 1.0 / _GN_COUNT
    mean = jnp.sum(zb, axis=1, keepdims=True) * inv_n                     # (B, 1)
    var = jnp.sum(qb, axis=1, keepdims=True) * inv_n - mean * mean
    rstd = jax.lax.rsqrt(var + 1e-5)
    mean4 = jnp.concatenate([mean, mean, mean, mean], axis=0)             # (4B, 1)
    rstd4 = jnp.concatenate([rstd, rstd, rstd, rstd], axis=0)
    xn = (z2 - mean4) * rstd4 * aff2_ref[2] + aff2_ref[3]                 # (4B, 256)

    # ---- conv1d (kernel_size=1): one matmul for all samples/positions.
    y = jnp.dot(xn, wct_ref[...], preferred_element_type=jnp.float32)     # (4B, 64)

    # ---- head: max/mean pool over the 4 positions -> BatchNormWithScale
    # (eval) -> softsign -> PCA projection (feature_weights / pca_mu folded,
    # trimmed to the 60 used columns, k-means cross-term folded in too).
    y0, y1, y2, y3 = y[0:B], y[B:2 * B], y[2 * B:3 * B], y[3 * B:4 * B]
    ymax = jnp.maximum(jnp.maximum(y0, y1), jnp.maximum(y2, y3))
    ymean = (y0 + y1 + y2 + y3) * 0.25
    f = jnp.concatenate([ymax, ymean], axis=1)                            # (B, 128)
    f = f * aff4_ref[0] + aff4_ref[1]
    f = f / (1.0 + jnp.abs(f))                                            # softsign

    pa = jnp.dot(f, pcaw_ref[...], preferred_element_type=jnp.float32) + pcab_ref[0]  # (B, 90)
    pca_ref[...] = pa[:, 0:64]                                            # pca[:, :60] (+4 pad)

    # ---- cluster probabilities ---------------------------------------------
    # TODO(synk): StructuredKMeans source was not provided; its probability
    # output is approximated as softmax over negative squared center
    # distances (||p||^2 cancels inside the softmax, so only the folded
    # 2<p,c> - ||c||^2 term, columns 64:90 of the PCA matmul, is needed).
    logits = pa[:, 64:90]
    m = jnp.max(logits, axis=1, keepdims=True)
    e = jnp.exp(logits - m)
    prob_ref[...] = e / jnp.sum(e, axis=1, keepdims=True)


# ---------------------------------------------------------------------------
# Wrapper: single pallas_call for the whole forward pass
# ---------------------------------------------------------------------------

def forward(kp, x):
    B = x.shape[0]
    # layout plumbing only: months on sublanes, [low, precip, high] on lanes
    xt = jnp.transpose(x.astype(jnp.float32), (0, 2, 1))                  # (B, 12, 3)
    vmem = pl.BlockSpec(memory_space=pltpu.MemorySpace.VMEM)
    pca, prob = pl.pallas_call(
        _dlmodel_kernel,
        out_shape=(jax.ShapeDtypeStruct((B, 64), jnp.float32),
                   jax.ShapeDtypeStruct((B, 26), jnp.float32)),
        in_specs=[vmem] * 10,
        out_specs=(vmem, vmem),
    )(xt, kp["act_ab"], kp["w1"], kp["aff1"], kp["w2"], kp["aff2"],
      kp["wct"], kp["aff4"], kp["pcaw"], kp["pcab"])
    return pca[:, 0], pca[:, 1], prob


# ---------------------------------------------------------------------------
# Parameters (deterministic, synthetic, torch layout)
# ---------------------------------------------------------------------------

def init_params(key):
    ks = jax.random.split(key, 32)

    def w(k, shape, scale=0.1):
        return scale * jax.random.normal(k, shape, dtype=jnp.float32)

    def fold_bn(kg, kb, km, kv, C, affine=True, scale_key=None):
        gamma = (1.0 + 0.1 * jax.random.normal(kg, (C,), jnp.float32)
                 if affine else jnp.ones((C,), jnp.float32))
        beta = (0.1 * jax.random.normal(kb, (C,), jnp.float32)
                if affine else jnp.zeros((C,), jnp.float32))
        rm = 0.1 * jax.random.normal(km, (C,), jnp.float32)
        rv = 1.0 + 0.1 * jnp.abs(jax.random.normal(kv, (C,), jnp.float32))
        if scale_key is not None:               # BatchNormWithScale.scale
            gamma = gamma * (1.0 + 0.1 * jax.random.normal(scale_key, (C,), jnp.float32))
        s = gamma / jnp.sqrt(rv + 1e-5)
        return s, beta - rm * s

    p = {}
    # MyActivationLayer constants (exact values from the module)
    p["temp_mu"] = jnp.array([-18.0, 0.0, 10.0, 22.0], jnp.float32)
    p["temp_sigma"] = jnp.array([6.0], jnp.float32)
    p["precip_mu"] = jnp.array([10.0, 40.0, 100.0], jnp.float32)
    p["precip_sigma"] = jnp.array([10.0, 20.0, 50.0], jnp.float32)
    p["precip_mu_log"] = jnp.array([2.0, 4.0, 5.0], jnp.float32)
    p["precip_sigma_log"] = jnp.array([1.0], jnp.float32)
    # Conv weights (torch layout)
    p["gconv1_w"] = w(ks[0], (32, 1, 3, 3))     # Conv2d(2,32,3,groups=2)
    p["gconv3_w"] = w(ks[1], (2, 1, 3, 5))      # Conv2d(2,2,(3,5),groups=2)
    p["conv1_w"] = w(ks[2], (32, 32, 3, 3))
    p["conv2_w"] = w(ks[3], (32, 32, 3, 3))
    p["gconv2_w"] = w(ks[4], (32, 1, 5, 3))     # depthwise, groups=32
    p["conv1d_w"] = w(ks[5], (60, 230))         # Conv1d(230,60,1)
    # Batch norms (eval mode, folded)
    p["bn1_s"], p["bn1_b"] = fold_bn(ks[6], ks[7], ks[8], ks[9], 32)
    p["bn2_s"], p["bn2_b"] = fold_bn(ks[10], ks[11], ks[12], ks[13], 32)
    p["bn3_s"], p["bn3_b"] = fold_bn(ks[14], ks[15], ks[16], ks[17], 96)
    p["bn4_s"], p["bn4_b"] = fold_bn(ks[18], ks[19], ks[20], ks[21], 120,
                                     affine=False, scale_key=ks[22])
    # GroupNorm(1, 230) affine params
    p["ln_g"] = 1.0 + 0.1 * jax.random.normal(ks[23], (230,), jnp.float32)
    p["ln_b"] = 0.1 * jax.random.normal(ks[24], (230,), jnp.float32)
    # PCA / cluster parameters (module inits these to zeros; randomized here)
    p["feature_weights"] = w(ks[25], (1, 120), 1.0)
    p["pca_mu"] = w(ks[26], (1, 120), 0.1)
    p["pca_coeff"] = w(ks[27], (120, 120), 0.1)
    p["centers"] = w(ks[28], (26, 60), 0.5)
    return p


# ---------------------------------------------------------------------------
# One-time re-layout of torch-convention params into kernel operands
# ---------------------------------------------------------------------------

def prepare_params(p):
    f32 = np.float32
    k = {}

    # --- activation: per-variant affine (v = g*9 + h), value = raw*a + b ---
    tmu = np.asarray(p["temp_mu"], f32)
    ts = float(np.asarray(p["temp_sigma"])[0])
    pmu = np.asarray(p["precip_mu"], f32)
    psg = np.asarray(p["precip_sigma"], f32)
    plm = np.asarray(p["precip_mu_log"], f32)
    psl = float(np.asarray(p["precip_sigma_log"])[0])
    t_idx = {0: 0, 2: 1, 3: 1, 5: 2, 6: 2, 8: 3}         # h -> temp_mu index
    a18 = np.zeros((18,), f32)
    b18 = np.zeros((18,), f32)
    for g in range(2):
        for h in range(9):
            v = g * 9 + h
            if h in (1, 4, 7):
                i = (h - 1) // 3
                if g == 0:
                    a18[v] = 1.0 / psg[i]
                    b18[v] = -pmu[i] / psg[i]
                else:
                    a18[v] = 1.0 / psl
                    b18[v] = -plm[i] / psl
            else:
                i = t_idx[h]
                a18[v] = 1.0 / ts
                b18[v] = -tmu[i] / ts
    k["act_ab"] = jnp.asarray(np.stack([a18, b18], axis=0))              # (2, 18)

    # --- stage 1 weight: grouped_conv1 im2col patch + grouped_conv3 --------
    # LHS lane = jj*18 + g*9 + row   (jj = window offset 0..4, row 0..8)
    # output col j < 672: j = r*96 + kw2*32 + c  (r = x1 row, kw2 = in-window
    # column offset, c = x1 channel);  cols 672..677 = gconv3 (g*3 + h).
    w1t = np.asarray(p["gconv1_w"], f32)
    w3t = np.asarray(p["gconv3_w"], f32)
    w1 = np.zeros((90, 678), f32)
    for c in range(32):
        g = c // 16
        for r in range(7):
            for kw2 in range(3):
                col = r * 96 + kw2 * 32 + c
                for kh in range(3):
                    for kw in range(3):
                        row = (kw2 + kw) * 18 + g * 9 + (r + kh)
                        w1[row, col] = w1t[c, 0, kh, kw]
    for g in range(2):
        for h in range(3):
            col = 672 + g * 3 + h
            for kh in range(3):
                for kw in range(5):
                    row = kw * 18 + g * 9 + (h + 3 * kh)
                    w1[row, col] = w3t[g, 0, kh, kw]
    k["w1"] = jnp.asarray(w1)

    bn1_s = np.asarray(p["bn1_s"], f32)
    bn1_b = np.asarray(p["bn1_b"], f32)
    s1 = np.ones((678,), f32)
    b1 = np.zeros((678,), f32)
    s1[:672] = np.tile(bn1_s, 21)
    b1[:672] = np.tile(bn1_b, 21)
    k["aff1"] = jnp.asarray(np.stack([s1, b1], axis=0))                  # (2, 678)

    # --- stage 2 weight: conv1 / conv2 / grouped_conv2 + gconv3 identity ----
    # output lanes: [0:32] conv1 co ; [32:128] conv2 (oh*32+co) ;
    # [128:224] gconv2 (oh*32+c) ; [224:230] gconv3 ; [230:256] zero pad.
    W1c = np.asarray(p["conv1_w"], f32)
    W2c = np.asarray(p["conv2_w"], f32)
    Wd = np.asarray(p["gconv2_w"], f32)
    w2 = np.zeros((678, 256), f32)
    for kh in range(3):                               # conv1: rows 3*kh, dilation (3,1)
        for kw in range(3):
            r0 = (3 * kh) * 96 + kw * 32
            w2[r0:r0 + 32, 0:32] = W1c[:, :, kh, kw].T
    for oh in range(3):                               # conv2: rows oh+2*kh, dilation (2,1)
        for kh in range(3):
            for kw in range(3):
                r0 = (oh + 2 * kh) * 96 + kw * 32
                w2[r0:r0 + 32, 32 + oh * 32:32 + oh * 32 + 32] = W2c[:, :, kh, kw].T
    idx = np.arange(32)
    for oh in range(3):                               # gconv2: depthwise (5,3)
        for kh in range(5):
            for kw in range(3):
                w2[(oh + kh) * 96 + kw * 32 + idx, 128 + oh * 32 + idx] = Wd[:, 0, kh, kw]
    for t in range(6):                                # gconv3 pass-through
        w2[672 + t, 224 + t] = 1.0
    k["w2"] = jnp.asarray(w2)

    # BN2 | BN3 | identity | identity | zero-pad, plus GroupNorm affine, all in
    # kernel lane order (perm96 maps kernel position oh*32+c -> torch c*3+oh).
    perm96 = np.array([c * 3 + h for h in range(3) for c in range(32)], dtype=np.int64)
    perm230 = np.concatenate([np.arange(32), 32 + perm96, 128 + perm96,
                              np.arange(224, 230)])
    s2 = np.zeros((256,), f32)
    b2 = np.zeros((256,), f32)
    s2[0:32] = np.asarray(p["bn2_s"])
    b2[0:32] = np.asarray(p["bn2_b"])
    s2[32:128] = np.asarray(p["bn3_s"])[perm96]
    b2[32:128] = np.asarray(p["bn3_b"])[perm96]
    s2[128:230] = 1.0
    gn_g = np.zeros((256,), f32)
    gn_b = np.zeros((256,), f32)
    gn_g[0:230] = np.asarray(p["ln_g"])[perm230]
    gn_b[0:230] = np.asarray(p["ln_b"])[perm230]
    k["aff2"] = jnp.asarray(np.stack([s2, b2, gn_g, gn_b], axis=0))      # (4, 256)

    # conv1d weight, rows permuted to kernel lane order, lane-padded.
    wct = np.zeros((256, 64), f32)
    wct[0:230, 0:60] = np.asarray(p["conv1d_w"], f32)[:, perm230].T
    k["wct"] = jnp.asarray(wct)                                          # (256, 64)

    # BatchNormWithScale(120) folded; feature lanes = [max 60, pad 4, mean 60, pad 4]
    bn4_s = np.asarray(p["bn4_s"], f32)
    bn4_b = np.asarray(p["bn4_b"], f32)
    s4 = np.zeros((128,), f32)
    b4 = np.zeros((128,), f32)
    s4[0:60] = bn4_s[0:60]
    s4[64:124] = bn4_s[60:120]
    b4[0:60] = bn4_b[0:60]
    b4[64:124] = bn4_b[60:120]
    k["aff4"] = jnp.asarray(np.stack([s4, b4], axis=0))                  # (2, 128)

    # PCA projection (feature_weights / pca_mu folded), trimmed to the 60 used
    # columns; k-means cross-term 2<p,c> - |c|^2 folded as columns 64:90.
    C = np.asarray(p["pca_coeff"], f32)
    fw = np.asarray(p["feature_weights"], f32)[0]
    pmu_pca = np.asarray(p["pca_mu"], f32)
    cen = np.asarray(p["centers"], f32)
    Wp = (fw[:, None] * C)[:, 0:60]                                       # (120, 60)
    bp = (-(pmu_pca @ C))[0, 0:60]                                        # (60,)
    Wl = Wp @ (2.0 * cen.T)                                               # (120, 26)
    bl = bp @ (2.0 * cen.T) - np.sum(cen * cen, axis=1)                   # (26,)
    pcaw = np.zeros((128, 90), f32)
    pcab = np.zeros((1, 90), f32)
    pcaw[0:60, 0:60] = Wp[0:60, :]
    pcaw[64:124, 0:60] = Wp[60:120, :]
    pcaw[0:60, 64:90] = Wl[0:60, :]
    pcaw[64:124, 64:90] = Wl[60:120, :]
    pcab[0, 0:60] = bp
    pcab[0, 64:90] = bl
    k["pcaw"] = jnp.asarray(pcaw)                                         # (128, 90)
    k["pcab"] = jnp.asarray(pcab)                                         # (1, 90)
    return k


if __name__ == "__main__":
    key = jax.random.PRNGKey(0)
    kparam_key, kx = jax.random.split(key)
    params = init_params(kparam_key)
    kparams = prepare_params(params)

    # input: (batch=2, 3 rows [low_temp, precip, high_temp], 12 months)
    x = jax.random.normal(kx, (2, 3, 12), dtype=jnp.float32)
    x = x.at[:, 0, :].set(x[:, 0, :] * 10.0 - 5.0)          # low temps
    x = x.at[:, 1, :].set(jnp.abs(x[:, 1, :]) * 30.0)       # precipitation > 0
    x = x.at[:, 2, :].set(x[:, 2, :] * 10.0 + 15.0)         # high temps

    f0, f1, prob = jax.jit(forward)(kparams, x)
    jax.block_until_ready((f0, f1, prob))
    assert f0.shape == (2,) and f1.shape == (2,) and prob.shape == (2, 26)
    assert bool(jnp.all(jnp.isfinite(prob)))
    print("KERNEL_OK")
</pallas_src>

<mosaic_0001>
module attributes {stable_mosaic.version = 11 : i64} {
  func.func @_dlmodel_kernel(%arg0: memref<2x12x3xf32, #tpu.memory_space<vmem>>, %arg1: memref<2x18xf32, #tpu.memory_space<vmem>>, %arg2: memref<90x678xf32, #tpu.memory_space<vmem>>, %arg3: memref<2x678xf32, #tpu.memory_space<vmem>>, %arg4: memref<678x256xf32, #tpu.memory_space<vmem>>, %arg5: memref<4x256xf32, #tpu.memory_space<vmem>>, %arg6: memref<256x64xf32, #tpu.memory_space<vmem>>, %arg7: memref<2x128xf32, #tpu.memory_space<vmem>>, %arg8: memref<128x90xf32, #tpu.memory_space<vmem>>, %arg9: memref<1x90xf32, #tpu.memory_space<vmem>>, %arg10: memref<2x64xf32, #tpu.memory_space<vmem>>, %arg11: memref<2x26xf32, #tpu.memory_space<vmem>>) attributes {dimension_semantics = [], scalar_prefetch = 0 : i64, scratch_operands = 0 : i64, tpu.core_type = #tpu.core_type<tc>} {
    %c0 = arith.constant 0 : index
    %c0_0 = arith.constant 0 : index
    %c0_1 = arith.constant 0 : index
    %0 = vector.load %arg0[%c0, %c0_0, %c0_1] : memref<2x12x3xf32, #tpu.memory_space<vmem>>, vector<2x12x3xf32>
    %1 = vector.extract_strided_slice %0 {offsets = [0, 0, 0], sizes = [2, 12, 1], strides = [1, 1, 1]} : vector<2x12x3xf32> to vector<2x12x1xf32>
    %2 = vector.extract_strided_slice %0 {offsets = [0, 0, 1], sizes = [2, 12, 1], strides = [1, 1, 1]} : vector<2x12x3xf32> to vector<2x12x1xf32>
    %3 = vector.extract_strided_slice %0 {offsets = [0, 0, 2], sizes = [2, 12, 1], strides = [1, 1, 1]} : vector<2x12x3xf32> to vector<2x12x1xf32>
    %cst = arith.constant 1.000000e+00 : f32
    %4 = vector.broadcast %cst : f32 to vector<2x12x1xf32>
    %5 = arith.addf %2, %4 : vector<2x12x1xf32>
    %6 = math.log %5 : vector<2x12x1xf32>
    %7 = tpu.concatenate %1, %2, %3, %1, %2, %3, %1, %2, %3, %1, %6, %3, %1, %6, %3, %1 in 2 : vector<2x12x1xf32>, vector<2x12x1xf32>, vector<2x12x1xf32>, vector<2x12x1xf32>, vector<2x12x1xf32>, vector<2x12x1xf32>, vector<2x12x1xf32>, vector<2x12x1xf32>, vector<2x12x1xf32>, vector<2x12x1xf32>, vector<2x12x1xf32>, vector<2x12x1xf32>, vector<2x12x1xf32>, vector<2x12x1xf32>, vector<2x12x1xf32>, vector<2x12x1xf32> -> vector<2x12x16xf32>
    %8 = tpu.concatenate %6, %3 in 2 : vector<2x12x1xf32>, vector<2x12x1xf32> -> vector<2x12x2xf32>
    %9 = tpu.concatenate %7, %8 in 2 : vector<2x12x16xf32>, vector<2x12x2xf32> -> vector<2x12x18xf32>
    %c0_2 = arith.constant 0 : index
    %c0_3 = arith.constant 0 : index
    %10 = vector.load %arg1[%c0_2, %c0_3] : memref<2x18xf32, #tpu.memory_space<vmem>>, vector<1x18xf32>
    %11 = vector.shape_cast %10 : vector<1x18xf32> to vector<18xf32>
    %12 = vector.shape_cast %11 : vector<18xf32> to vector<1x1x18xf32>
    %13 = vector.broadcast %12 : vector<1x1x18xf32> to vector<2x12x18xf32>
    %14 = arith.mulf %9, %13 : vector<2x12x18xf32>
    %c1 = arith.constant 1 : index
    %c0_4 = arith.constant 0 : index
    %15 = vector.load %arg1[%c1, %c0_4] : memref<2x18xf32, #tpu.memory_space<vmem>>, vector<1x18xf32>
    %16 = vector.shape_cast %15 : vector<1x18xf32> to vector<18xf32>
    %17 = vector.shape_cast %16 : vector<18xf32> to vector<1x1x18xf32>
    %18 = vector.broadcast %17 : vector<1x1x18xf32> to vector<2x12x18xf32>
    %19 = arith.addf %14, %18 : vector<2x12x18xf32>
    %20 = math.tanh %19 : vector<2x12x18xf32>
    %21 = vector.extract_strided_slice %20 {offsets = [0, 10, 0], sizes = [2, 1, 18], strides = [1, 1, 1]} : vector<2x12x18xf32> to vector<2x1x18xf32>
    %22 = vector.shape_cast %21 : vector<2x1x18xf32> to vector<2x18xf32>
    %23 = vector.extract_strided_slice %20 {offsets = [0, 11, 0], sizes = [2, 1, 18], strides = [1, 1, 1]} : vector<2x12x18xf32> to vector<2x1x18xf32>
    %24 = vector.shape_cast %23 : vector<2x1x18xf32> to vector<2x18xf32>
    %25 = vector.extract_strided_slice %20 {offsets = [0, 0, 0], sizes = [2, 1, 18], strides = [1, 1, 1]} : vector<2x12x18xf32> to vector<2x1x18xf32>
    %26 = vector.shape_cast %25 : vector<2x1x18xf32> to vector<2x18xf32>
    %27 = vector.extract_strided_slice %20 {offsets = [0, 1, 0], sizes = [2, 1, 18], strides = [1, 1, 1]} : vector<2x12x18xf32> to vector<2x1x18xf32>
    %28 = vector.shape_cast %27 : vector<2x1x18xf32> to vector<2x18xf32>
    %29 = vector.extract_strided_slice %20 {offsets = [0, 2, 0], sizes = [2, 1, 18], strides = [1, 1, 1]} : vector<2x12x18xf32> to vector<2x1x18xf32>
    %30 = vector.shape_cast %29 : vector<2x1x18xf32> to vector<2x18xf32>
    %31 = tpu.concatenate %22, %24, %26, %28, %30 in 1 : vector<2x18xf32>, vector<2x18xf32>, vector<2x18xf32>, vector<2x18xf32>, vector<2x18xf32> -> vector<2x90xf32>
    %32 = vector.extract_strided_slice %20 {offsets = [0, 1, 0], sizes = [2, 1, 18], strides = [1, 1, 1]} : vector<2x12x18xf32> to vector<2x1x18xf32>
    %33 = vector.shape_cast %32 : vector<2x1x18xf32> to vector<2x18xf32>
    %34 = vector.extract_strided_slice %20 {offsets = [0, 2, 0], sizes = [2, 1, 18], strides = [1, 1, 1]} : vector<2x12x18xf32> to vector<2x1x18xf32>
    %35 = vector.shape_cast %34 : vector<2x1x18xf32> to vector<2x18xf32>
    %36 = vector.extract_strided_slice %20 {offsets = [0, 3, 0], sizes = [2, 1, 18], strides = [1, 1, 1]} : vector<2x12x18xf32> to vector<2x1x18xf32>
    %37 = vector.shape_cast %36 : vector<2x1x18xf32> to vector<2x18xf32>
    %38 = vector.extract_strided_slice %20 {offsets = [0, 4, 0], sizes = [2, 1, 18], strides = [1, 1, 1]} : vector<2x12x18xf32> to vector<2x1x18xf32>
    %39 = vector.shape_cast %38 : vector<2x1x18xf32> to vector<2x18xf32>
    %40 = vector.extract_strided_slice %20 {offsets = [0, 5, 0], sizes = [2, 1, 18], strides = [1, 1, 1]} : vector<2x12x18xf32> to vector<2x1x18xf32>
    %41 = vector.shape_cast %40 : vector<2x1x18xf32> to vector<2x18xf32>
    %42 = tpu.concatenate %33, %35, %37, %39, %41 in 1 : vector<2x18xf32>, vector<2x18xf32>, vector<2x18xf32>, vector<2x18xf32>, vector<2x18xf32> -> vector<2x90xf32>
    %43 = vector.extract_strided_slice %20 {offsets = [0, 4, 0], sizes = [2, 1, 18], strides = [1, 1, 1]} : vector<2x12x18xf32> to vector<2x1x18xf32>
    %44 = vector.shape_cast %43 : vector<2x1x18xf32> to vector<2x18xf32>
    %45 = vector.extract_strided_slice %20 {offsets = [0, 5, 0], sizes = [2, 1, 18], strides = [1, 1, 1]} : vector<2x12x18xf32> to vector<2x1x18xf32>
    %46 = vector.shape_cast %45 : vector<2x1x18xf32> to vector<2x18xf32>
    %47 = vector.extract_strided_slice %20 {offsets = [0, 6, 0], sizes = [2, 1, 18], strides = [1, 1, 1]} : vector<2x12x18xf32> to vector<2x1x18xf32>
    %48 = vector.shape_cast %47 : vector<2x1x18xf32> to vector<2x18xf32>
    %49 = vector.extract_strided_slice %20 {offsets = [0, 7, 0], sizes = [2, 1, 18], strides = [1, 1, 1]} : vector<2x12x18xf32> to vector<2x1x18xf32>
    %50 = vector.shape_cast %49 : vector<2x1x18xf32> to vector<2x18xf32>
    %51 = vector.extract_strided_slice %20 {offsets = [0, 8, 0], sizes = [2, 1, 18], strides = [1, 1, 1]} : vector<2x12x18xf32> to vector<2x1x18xf32>
    %52 = vector.shape_cast %51 : vector<2x1x18xf32> to vector<2x18xf32>
    %53 = tpu.concatenate %44, %46, %48, %50, %52 in 1 : vector<2x18xf32>, vector<2x18xf32>, vector<2x18xf32>, vector<2x18xf32>, vector<2x18xf32> -> vector<2x90xf32>
    %54 = vector.extract_strided_slice %20 {offsets = [0, 7, 0], sizes = [2, 1, 18], strides = [1, 1, 1]} : vector<2x12x18xf32> to vector<2x1x18xf32>
    %55 = vector.shape_cast %54 : vector<2x1x18xf32> to vector<2x18xf32>
    %56 = vector.extract_strided_slice %20 {offsets = [0, 8, 0], sizes = [2, 1, 18], strides = [1, 1, 1]} : vector<2x12x18xf32> to vector<2x1x18xf32>
    %57 = vector.shape_cast %56 : vector<2x1x18xf32> to vector<2x18xf32>
    %58 = vector.extract_strided_slice %20 {offsets = [0, 9, 0], sizes = [2, 1, 18], strides = [1, 1, 1]} : vector<2x12x18xf32> to vector<2x1x18xf32>
    %59 = vector.shape_cast %58 : vector<2x1x18xf32> to vector<2x18xf32>
    %60 = vector.extract_strided_slice %20 {offsets = [0, 10, 0], sizes = [2, 1, 18], strides = [1, 1, 1]} : vector<2x12x18xf32> to vector<2x1x18xf32>
    %61 = vector.shape_cast %60 : vector<2x1x18xf32> to vector<2x18xf32>
    %62 = vector.extract_strided_slice %20 {offsets = [0, 11, 0], sizes = [2, 1, 18], strides = [1, 1, 1]} : vector<2x12x18xf32> to vector<2x1x18xf32>
    %63 = vector.shape_cast %62 : vector<2x1x18xf32> to vector<2x18xf32>
    %64 = tpu.concatenate %55, %57, %59, %61, %63 in 1 : vector<2x18xf32>, vector<2x18xf32>, vector<2x18xf32>, vector<2x18xf32>, vector<2x18xf32> -> vector<2x90xf32>
    %65 = tpu.concatenate %31, %42, %53, %64 in 0 : vector<2x90xf32>, vector<2x90xf32>, vector<2x90xf32>, vector<2x90xf32> -> vector<8x90xf32>
    %c0_5 = arith.constant 0 : index
    %c0_6 = arith.constant 0 : index
    %66 = vector.load %arg2[%c0_5, %c0_6] : memref<90x678xf32, #tpu.memory_space<vmem>>, vector<90x678xf32>
    %cst_7 = arith.constant dense<0.000000e+00> : vector<8x678xf32>
    %67 = tpu.matmul %65, %66, %cst_7 {dimension_numbers = #tpu.dot_dimension_numbers<[1], [0], [0], [1], [0, 0, 1, 1], [], []>} : vector<8x90xf32>, vector<90x678xf32>, vector<8x678xf32> -> vector<8x678xf32>
    %c0_8 = arith.constant 0 : index
    %c0_9 = arith.constant 0 : index
    %68 = vector.load %arg3[%c0_8, %c0_9] : memref<2x678xf32, #tpu.memory_space<vmem>>, vector<1x678xf32>
    %69 = vector.shape_cast %68 : vector<1x678xf32> to vector<678xf32>
    %70 = vector.shape_cast %69 : vector<678xf32> to vector<1x678xf32>
    %71 = vector.broadcast %70 : vector<1x678xf32> to vector<8x678xf32>
    %72 = arith.mulf %67, %71 : vector<8x678xf32>
    %c1_10 = arith.constant 1 : index
    %c0_11 = arith.constant 0 : index
    %73 = vector.load %arg3[%c1_10, %c0_11] : memref<2x678xf32, #tpu.memory_space<vmem>>, vector<1x678xf32>
    %74 = vector.shape_cast %73 : vector<1x678xf32> to vector<678xf32>
    %75 = vector.shape_cast %74 : vector<678xf32> to vector<1x678xf32>
    %76 = vector.broadcast %75 : vector<1x678xf32> to vector<8x678xf32>
    %77 = arith.addf %72, %76 : vector<8x678xf32>
    %78 = tpu.iota {dimensions = array<i32: 1>} : vector<8x678xi32>
    %c672_i32 = arith.constant 672 : i32
    %79 = vector.broadcast %c672_i32 : i32 to vector<8x678xi32>
    %80 = arith.cmpi slt, %78, %79 : vector<8x678xi32>
    %cst_12 = arith.constant 0.000000e+00 : f32
    %81 = vector.broadcast %cst_12 : f32 to vector<8x678xf32>
    %82 = arith.maximumf %77, %81 : vector<8x678xf32>
    %83 = arith.select %80, %82, %77 : vector<8x678xi1>, vector<8x678xf32>
    %c0_13 = arith.constant 0 : index
    %c0_14 = arith.constant 0 : index
    %84 = vector.load %arg4[%c0_13, %c0_14] : memref<678x256xf32, #tpu.memory_space<vmem>>, vector<678x256xf32>
    %cst_15 = arith.constant dense<0.000000e+00> : vector<8x256xf32>
    %85 = tpu.matmul %83, %84, %cst_15 {dimension_numbers = #tpu.dot_dimension_numbers<[1], [0], [0], [1], [0, 0, 1, 1], [], []>} : vector<8x678xf32>, vector<678x256xf32>, vector<8x256xf32> -> vector<8x256xf32>
    %c0_16 = arith.constant 0 : index
    %c0_17 = arith.constant 0 : index
    %86 = vector.load %arg5[%c0_16, %c0_17] : memref<4x256xf32, #tpu.memory_space<vmem>>, vector<1x256xf32>
    %87 = vector.shape_cast %86 : vector<1x256xf32> to vector<256xf32>
    %88 = vector.shape_cast %87 : vector<256xf32> to vector<1x256xf32>
    %89 = vector.broadcast %88 : vector<1x256xf32> to vector<8x256xf32>
    %90 = arith.mulf %85, %89 : vector<8x256xf32>
    %c1_18 = arith.constant 1 : index
    %c0_19 = arith.constant 0 : index
    %91 = vector.load %arg5[%c1_18, %c0_19] : memref<4x256xf32, #tpu.memory_space<vmem>>, vector<1x256xf32>
    %92 = vector.shape_cast %91 : vector<1x256xf32> to vector<256xf32>
    %93 = vector.shape_cast %92 : vector<256xf32> to vector<1x256xf32>
    %94 = vector.broadcast %93 : vector<1x256xf32> to vector<8x256xf32>
    %95 = arith.addf %90, %94 : vector<8x256xf32>
    %96 = tpu.iota {dimensions = array<i32: 1>} : vector<8x256xi32>
    %c128_i32 = arith.constant 128 : i32
    %97 = vector.broadcast %c128_i32 : i32 to vector<8x256xi32>
    %98 = arith.cmpi slt, %96, %97 : vector<8x256xi32>
    %cst_20 = arith.constant 0.000000e+00 : f32
    %99 = vector.broadcast %cst_20 : f32 to vector<8x256xf32>
    %100 = arith.maximumf %95, %99 : vector<8x256xf32>
    %101 = arith.select %98, %100, %95 : vector<8x256xi1>, vector<8x256xf32>
    %102 = arith.mulf %101, %101 : vector<8x256xf32>
    %103 = vector.extract_strided_slice %101 {offsets = [0, 0], sizes = [2, 256], strides = [1, 1]} : vector<8x256xf32> to vector<2x256xf32>
    %104 = vector.extract_strided_slice %101 {offsets = [2, 0], sizes = [2, 256], strides = [1, 1]} : vector<8x256xf32> to vector<2x256xf32>
    %105 = arith.addf %103, %104 : vector<2x256xf32>
    %106 = vector.extract_strided_slice %101 {offsets = [4, 0], sizes = [2, 256], strides = [1, 1]} : vector<8x256xf32> to vector<2x256xf32>
    %107 = arith.addf %105, %106 : vector<2x256xf32>
    %108 = vector.extract_strided_slice %101 {offsets = [6, 0], sizes = [2, 256], strides = [1, 1]} : vector<8x256xf32> to vector<2x256xf32>
    %109 = arith.addf %107, %108 : vector<2x256xf32>
    %110 = vector.extract_strided_slice %102 {offsets = [0, 0], sizes = [2, 256], strides = [1, 1]} : vector<8x256xf32> to vector<2x256xf32>
    %111 = vector.extract_strided_slice %102 {offsets = [2, 0], sizes = [2, 256], strides = [1, 1]} : vector<8x256xf32> to vector<2x256xf32>
    %112 = arith.addf %110, %111 : vector<2x256xf32>
    %113 = vector.extract_strided_slice %102 {offsets = [4, 0], sizes = [2, 256], strides = [1, 1]} : vector<8x256xf32> to vector<2x256xf32>
    %114 = arith.addf %112, %113 : vector<2x256xf32>
    %115 = vector.extract_strided_slice %102 {offsets = [6, 0], sizes = [2, 256], strides = [1, 1]} : vector<8x256xf32> to vector<2x256xf32>
    %116 = arith.addf %114, %115 : vector<2x256xf32>
    %cst_21 = arith.constant dense<0.000000e+00> : vector<2xf32>
    %117 = vector.multi_reduction <add>, %109, %cst_21 [1] : vector<2x256xf32> to vector<2xf32>
    %118 = vector.shape_cast %117 : vector<2xf32> to vector<2x1xf32>
    %cst_22 = arith.constant 0.00108695647 : f32
    %119 = vector.broadcast %cst_22 : f32 to vector<2x1xf32>
    %120 = arith.mulf %118, %119 : vector<2x1xf32>
    %cst_23 = arith.constant dense<0.000000e+00> : vector<2xf32>
    %121 = vector.multi_reduction <add>, %116, %cst_23 [1] : vector<2x256xf32> to vector<2xf32>
    %122 = vector.shape_cast %121 : vector<2xf32> to vector<2x1xf32>
    %cst_24 = arith.constant 0.00108695647 : f32
    %123 = vector.broadcast %cst_24 : f32 to vector<2x1xf32>
    %124 = arith.mulf %122, %123 : vector<2x1xf32>
    %125 = arith.mulf %120, %120 : vector<2x1xf32>
    %126 = arith.subf %124, %125 : vector<2x1xf32>
    %cst_25 = arith.constant 9.99999974E-6 : f32
    %127 = vector.broadcast %cst_25 : f32 to vector<2x1xf32>
    %128 = arith.addf %126, %127 : vector<2x1xf32>
    %129 = math.rsqrt %128 : vector<2x1xf32>
    %130 = tpu.concatenate %120, %120, %120, %120 in 0 : vector<2x1xf32>, vector<2x1xf32>, vector<2x1xf32>, vector<2x1xf32> -> vector<8x1xf32>
    %131 = tpu.concatenate %129, %129, %129, %129 in 0 : vector<2x1xf32>, vector<2x1xf32>, vector<2x1xf32>, vector<2x1xf32> -> vector<8x1xf32>
    %132 = vector.broadcast %130 : vector<8x1xf32> to vector<8x256xf32>
    %133 = arith.subf %101, %132 : vector<8x256xf32>
    %134 = vector.broadcast %131 : vector<8x1xf32> to vector<8x256xf32>
    %135 = arith.mulf %133, %134 : vector<8x256xf32>
    %c2 = arith.constant 2 : index
    %c0_26 = arith.constant 0 : index
    %136 = vector.load %arg5[%c2, %c0_26] : memref<4x256xf32, #tpu.memory_space<vmem>>, vector<1x256xf32>
    %137 = vector.shape_cast %136 : vector<1x256xf32> to vector<256xf32>
    %138 = vector.shape_cast %137 : vector<256xf32> to vector<1x256xf32>
    %139 = vector.broadcast %138 : vector<1x256xf32> to vector<8x256xf32>
    %140 = arith.mulf %135, %139 : vector<8x256xf32>
    %c3 = arith.constant 3 : index
    %c0_27 = arith.constant 0 : index
    %141 = vector.load %arg5[%c3, %c0_27] : memref<4x256xf32, #tpu.memory_space<vmem>>, vector<1x256xf32>
    %142 = vector.shape_cast %141 : vector<1x256xf32> to vector<256xf32>
    %143 = vector.shape_cast %142 : vector<256xf32> to vector<1x256xf32>
    %144 = vector.broadcast %143 : vector<1x256xf32> to vector<8x256xf32>
    %145 = arith.addf %140, %144 : vector<8x256xf32>
    %c0_28 = arith.constant 0 : index
    %c0_29 = arith.constant 0 : index
    %146 = vector.load %arg6[%c0_28, %c0_29] : memref<256x64xf32, #tpu.memory_space<vmem>>, vector<256x64xf32>
    %cst_30 = arith.constant dense<0.000000e+00> : vector<8x64xf32>
    %147 = tpu.matmul %145, %146, %cst_30 {dimension_numbers = #tpu.dot_dimension_numbers<[1], [0], [0], [1], [0, 0, 1, 1], [], []>} : vector<8x256xf32>, vector<256x64xf32>, vector<8x64xf32> -> vector<8x64xf32>
    %148 = vector.extract_strided_slice %147 {offsets = [0, 0], sizes = [2, 64], strides = [1, 1]} : vector<8x64xf32> to vector<2x64xf32>
    %149 = vector.extract_strided_slice %147 {offsets = [2, 0], sizes = [2, 64], strides = [1, 1]} : vector<8x64xf32> to vector<2x64xf32>
    %150 = vector.extract_strided_slice %147 {offsets = [4, 0], sizes = [2, 64], strides = [1, 1]} : vector<8x64xf32> to vector<2x64xf32>
    %151 = vector.extract_strided_slice %147 {offsets = [6, 0], sizes = [2, 64], strides = [1, 1]} : vector<8x64xf32> to vector<2x64xf32>
    %152 = arith.maximumf %148, %149 : vector<2x64xf32>
    %153 = arith.maximumf %150, %151 : vector<2x64xf32>
    %154 = arith.maximumf %152, %153 : vector<2x64xf32>
    %155 = arith.addf %148, %149 : vector<2x64xf32>
    %156 = arith.addf %155, %150 : vector<2x64xf32>
    %157 = arith.addf %156, %151 : vector<2x64xf32>
    %cst_31 = arith.constant 2.500000e-01 : f32
    %158 = vector.broadcast %cst_31 : f32 to vector<2x64xf32>
    %159 = arith.mulf %157, %158 : vector<2x64xf32>
    %160 = tpu.concatenate %154, %159 in 1 : vector<2x64xf32>, vector<2x64xf32> -> vector<2x128xf32>
    %c0_32 = arith.constant 0 : index
    %c0_33 = arith.constant 0 : index
    %161 = vector.load %arg7[%c0_32, %c0_33] : memref<2x128xf32, #tpu.memory_space<vmem>>, vector<1x128xf32>
    %162 = vector.shape_cast %161 : vector<1x128xf32> to vector<128xf32>
    %163 = vector.shape_cast %162 : vector<128xf32> to vector<1x128xf32>
    %164 = vector.broadcast %163 : vector<1x128xf32> to vector<2x128xf32>
    %165 = arith.mulf %160, %164 : vector<2x128xf32>
    %c1_34 = arith.constant 1 : index
    %c0_35 = arith.constant 0 : index
    %166 = vector.load %arg7[%c1_34, %c0_35] : memref<2x128xf32, #tpu.memory_space<vmem>>, vector<1x128xf32>
    %167 = vector.shape_cast %166 : vector<1x128xf32> to vector<128xf32>
    %168 = vector.shape_cast %167 : vector<128xf32> to vector<1x128xf32>
    %169 = vector.broadcast %168 : vector<1x128xf32> to vector<2x128xf32>
    %170 = arith.addf %165, %169 : vector<2x128xf32>
    %171 = math.absf %170 : vector<2x128xf32>
    %cst_36 = arith.constant 1.000000e+00 : f32
    %172 = vector.broadcast %cst_36 : f32 to vector<2x128xf32>
    %173 = arith.addf %172, %171 : vector<2x128xf32>
    %174 = arith.divf %170, %173 : vector<2x128xf32>
    %c0_37 = arith.constant 0 : index
    %c0_38 = arith.constant 0 : index
    %175 = vector.load %arg8[%c0_37, %c0_38] : memref<128x90xf32, #tpu.memory_space<vmem>>, vector<128x90xf32>
    %cst_39 = arith.constant dense<0.000000e+00> : vector<2x90xf32>
    %176 = tpu.matmul %174, %175, %cst_39 {dimension_numbers = #tpu.dot_dimension_numbers<[1], [0], [0], [1], [0, 0, 1, 1], [], []>} : vector<2x128xf32>, vector<128x90xf32>, vector<2x90xf32> -> vector<2x90xf32>
    %c0_40 = arith.constant 0 : index
    %c0_41 = arith.constant 0 : index
    %177 = vector.load %arg9[%c0_40, %c0_41] : memref<1x90xf32, #tpu.memory_space<vmem>>, vector<1x90xf32>
    %178 = vector.shape_cast %177 : vector<1x90xf32> to vector<90xf32>
    %179 = vector.shape_cast %178 : vector<90xf32> to vector<1x90xf32>
    %180 = vector.broadcast %179 : vector<1x90xf32> to vector<2x90xf32>
    %181 = arith.addf %176, %180 : vector<2x90xf32>
    %182 = vector.extract_strided_slice %181 {offsets = [0, 0], sizes = [2, 64], strides = [1, 1]} : vector<2x90xf32> to vector<2x64xf32>
    %c0_42 = arith.constant 0 : index
    %c0_43 = arith.constant 0 : index
    %183 = vector.load %arg10[%c0_42, %c0_43] : memref<2x64xf32, #tpu.memory_space<vmem>>, vector<2x64xf32>
    tpu.vector_store %arg10[%c0_42, %c0_43], %182 {strides = array<i32>} : memref<2x64xf32, #tpu.memory_space<vmem>>, vector<2x64xf32>,
    %184 = vector.extract_strided_slice %181 {offsets = [0, 64], sizes = [2, 26], strides = [1, 1]} : vector<2x90xf32> to vector<2x26xf32>
    %cst_44 = arith.constant dense<0xFF800000> : vector<2xf32>
    %185 = vector.multi_reduction <maximumf>, %184, %cst_44 [1] : vector<2x26xf32> to vector<2xf32>
    %186 = vector.shape_cast %185 : vector<2xf32> to vector<2x1xf32>
    %187 = vector.broadcast %186 : vector<2x1xf32> to vector<2x26xf32>
    %188 = arith.subf %184, %187 : vector<2x26xf32>
    %189 = math.exp %188 : vector<2x26xf32>
    %cst_45 = arith.constant dense<0.000000e+00> : vector<2xf32>
    %190 = vector.multi_reduction <add>, %189, %cst_45 [1] : vector<2x26xf32> to vector<2xf32>
    %191 = vector.shape_cast %190 : vector<2xf32> to vector<2x1xf32>
    %192 = vector.broadcast %191 : vector<2x1xf32> to vector<2x26xf32>
    %193 = arith.divf %189, %192 : vector<2x26xf32>
    %c0_46 = arith.constant 0 : index
    %c0_47 = arith.constant 0 : index
    %194 = vector.load %arg11[%c0_46, %c0_47] : memref<2x26xf32, #tpu.memory_space<vmem>>, vector<2x26xf32>
    tpu.vector_store %arg11[%c0_46, %c0_47], %193 {strides = array<i32>} : memref<2x26xf32, #tpu.memory_space<vmem>>, vector<2x26xf32>,
    return
  }
}

</mosaic_0001>

<bundles_post_ra>
// kernel: forward.1
= control target key start
LH: loop header
LB: loop body
LE: loop exit
PB: predicated region body
PF: predicated region fallthrough
CT: control target
= control target key end

     0   :  { %17 = vsyncpa [#allocation3], 0  ;;  %s2740_s0 = inlined_call_operand.vmem [shape: f32[2,12,3], index: 0, kind: input, shape index: {}]   ;;  %s2741_s1 = inlined_call_operand.vmem [shape: f32[2,18], index: 1, kind: input, shape index: {}]   ;;  %s2742_s2 = inlined_call_operand.vmem [shape: f32[90,678], index: 2, kind: input, shape index: {}]   ;;  %s2743_s3 = inlined_call_operand.vmem [shape: f32[2,678], index: 3, kind: input, shape index: {}]   ;;  %s2744_s4 = inlined_call_operand.hbm [shape: f32[678,256], index: 4, kind: input, shape index: {}]   ;;  %s2745_s5 = inlined_call_operand.vmem [shape: f32[4,256], index: 5, kind: input, shape index: {}]   ;;  %s2746_s6 = inlined_call_operand.vmem [shape: f32[256,64], index: 6, kind: input, shape index: {}]   ;;  %s2747_s7 = inlined_call_operand.vmem [shape: f32[2,128], index: 7, kind: input, shape index: {}]   ;;  %s2748_s8 = inlined_call_operand.vmem [shape: f32[128,90], index: 8, kind: input, shape index: {}]   ;;  %s2749_s9 = inlined_call_operand.vmem [shape: f32[1,90], index: 9, kind: input, shape index: {}]   ;;  %s2750_s10 = inlined_call_operand.vmem [shape: f32[2,64], index: 10, kind: output, shape index: {0}]   ;;  %s2751_s11 = inlined_call_operand.hbm [shape: f32[2,26], index: 11, kind: output, shape index: {1}]  }
   0x1   :  { %18 = vsyncpa [#allocation4], 0  ;;  %s1878_s17 = smov [#allocation2]  }
   0x2   :  { %s32_s18 = sshll.u32 %s1878_s17, 4  ;;  %s33_s18 = int_to_ptr.vmem [resolvable:$true] %s32_s18 }
   0x3   :  { %s1842_s19 = scalar_lea.vmem %s33_s18, 21760  ;;  %p1847_p1 = scmp.lt.s32.totalorder %s33_s18, %s33_s18 }
   0x4   :  { %p1843_p0 = scmp.ne.s32.totalorder %s33_s18, %s1842_s19  ;;  %p1848_p2 = scmp.lt.s32.totalorder %s1842_s19, %s1842_s19 }
   0x6   :  { %p1849_p3 = por %p1848_p2, %p1847_p1 }
   0x8   :  { %p1850_p4 = pnand %p1849_p3, %p1843_p0 }
   0xa   :  { %1853 = shalt.err (!%p1850_p4)
}
   0xb   :  { %s1879_s20 = smov 256   ;;  %s1880_s21 = smov 16  }
   0xc   :  { %38 = dma.hbm_to_vmem [thread:$0]  %s2744_s4, 21760, %s33_s18, [#allocation3], %s1879_s20, %s1879_s20, %s1880_s21  }
   0xd   :  { %1874 = dma.done.wait [#allocation3], 21760  }
   0xe   :  { %1875 = vsyncadd [#allocation3], 4294945536  ;;  %v1963_v0 = vld [vmem:[%s2740_s0] sm:$0xff]  ;;  %v1968_v1 = vld [vmem:[%s2740_s0 + $0x8] sm:$0xf]  ;;  %s1881_s30 = smov 127  }
   0xf   :  { %v1973_v2 = vld [vmem:[%s2740_s0 + $0x10] sm:$0xff]  ;;  %237 = vrot.lane.b32.xlu1 %v1963_v0, %s1881_s30  ;;  %s1882_s4 = smov 3   ;;  %v56_v3 = vadd.f32 1.0, %v1963_v0  ;;  %v57_v4 = vadd.f32 1.0, %v1968_v1  ;;  %v1985_v6 = vld [vmem:[%s2740_s0 + $0x18] sm:$0xf] }
  0x10   :  { %72 = vrot.lane.b32.xlu0 %v1963_v0, %s1882_s4  ;;  %v58_v5 = vadd.f32 1.0, %v1973_v2  ;;  %v59_v7 = vadd.f32 1.0, %v1985_v6  ;;  %s1883_s0 = smov 6   ;;  %s1884_s14 = smov 9   ;;  %vm249_vm0 = vcmask 7168   ;;  %vm160_vm1 = vcmask 23552  }
  0x11   :  { %1810 = vlog2.f32 %v56_v3  ;;  %s1885_s15 = smov 12   ;;  %s1886_s16 = smov 15   ;;  %vm165_vm2 = vcmask 31744   ;;  %vm170_vm3 = vcmask 39936   ;;  %vm175_vm4 = vcmask 48128  }
  0x12   :  { %1812 = vlog2.f32 %v57_v4  ;;  %vm180_vm5 = vcmask 56320   ;;  %vm185_vm6 = vcmask 64512   ;;  %vm190_vm7 = vcmask 72704   ;;  %s1889_s26 = smov 54   ;;  %s1890_s23 = smov 72  }
  0x13   :  { %239 = vrot.lane.b32.xlu1 %v1968_v1, %s1881_s30  ;;  %1814 = vlog2.f32 %v58_v5  ;;  %vm195_vm8 = vcmask 80896   ;;  %vm200_vm9 = vcmask 89088   ;;  %vm205_vm10 = vcmask 97280  }
  0x14   :  { %1816 = vlog2.f32 %v59_v7  ;;  %vm210_vm11 = vcmask 105472   ;;  %vm215_vm12 = vcmask 113664   ;;  %vm220_vm13 = vcmask 121856  }
  0x15   :  { %vm270_vm14 = vcmask 130048   ;;  %vm441_vm15 = vcmask 1041408  }
  0x17   :  { %241 = vrot.lane.b32.xlu1 %v1973_v2, %s1881_s30 }
  0x1b   :  { %243 = vrot.lane.b32.xlu1 %v1985_v6, %s1881_s30 }
  0x1e   :  { %v1811_v8 = vpop.eup %1810 }
  0x1f   :  { %v1813_v9 = vpop.eup %1812  ;;  %v61_v10 = vmul.f32 0.6931472, %v1811_v8  ;;  %74 = vrot.lane.b32.xlu1 %v1968_v1, %s1882_s4 }
  0x20   :  { %v63_v11 = vmul.f32 0.6931472, %v1813_v9  ;;  %v1815_v12 = vpop.eup %1814 }
  0x21   :  { %225 = vrot.lane.b32.xlu0 %v61_v10, %s1881_s30  ;;  %v65_v13 = vmul.f32 0.6931472, %v1815_v12  ;;  %v1817_v14 = vpop.eup %1816 }
  0x22   :  { %v67_v15 = vmul.f32 0.6931472, %v1817_v14 }
  0x23   :  { %78 = vrot.lane.b32.xlu1 %v1985_v6, %s1882_s4 }
  0x25   :  { %227 = vrot.lane.b32.xlu0 %v63_v11, %s1881_s30 }
  0x27   :  { %86 = vrot.lane.b32.xlu1 %v1968_v1, %s1883_s0 }
  0x29   :  { %229 = vrot.lane.b32.xlu0 %v65_v13, %s1881_s30 }
  0x2b   :  { %90 = vrot.lane.b32.xlu1 %v1985_v6, %s1883_s0 }
  0x2d   :  { %231 = vrot.lane.b32.xlu0 %v67_v15, %s1881_s30 }
  0x2f   :  { %98 = vrot.lane.b32.xlu1 %v1968_v1, %s1884_s14 }
  0x31   :  { %76 = vrot.lane.b32.xlu0 %v1973_v2, %s1882_s4 }
  0x33   :  { %112 = vrot.lane.b32.xlu1 %v61_v10, %s1884_s14 }
  0x35   :  { %84 = vrot.lane.b32.xlu0 %v1963_v0, %s1883_s0 }
  0x37   :  { %102 = vrot.lane.b32.xlu1 %v1985_v6, %s1884_s14 }
  0x39   :  { %88 = vrot.lane.b32.xlu0 %v1973_v2, %s1883_s0 }
  0x3b   :  { %118 = vrot.lane.b32.xlu1 %v67_v15, %s1884_s14 }
  0x3d   :  { %96 = vrot.lane.b32.xlu0 %v1963_v0, %s1884_s14 }
  0x3f   :  { %126 = vrot.lane.b32.xlu1 %v1968_v1, %s1885_s15 }
  0x41   :  { %100 = vrot.lane.b32.xlu0 %v1973_v2, %s1884_s14 }
  0x43   :  { %136 = vrot.lane.b32.xlu1 %v61_v10, %s1885_s15 }
  0x45   :  { %114 = vrot.lane.b32.xlu0 %v63_v11, %s1884_s14 }
  0x47   :  { %130 = vrot.lane.b32.xlu1 %v1985_v6, %s1885_s15 }
  0x49   :  { %116 = vrot.lane.b32.xlu0 %v65_v13, %s1884_s14 }
  0x4b   :  { %142 = vrot.lane.b32.xlu1 %v67_v15, %s1885_s15 }
  0x4d   :  { %124 = vrot.lane.b32.xlu0 %v1963_v0, %s1885_s15 }
  0x4f   :  { %150 = vrot.lane.b32.xlu1 %v1968_v1, %s1886_s16 }
  0x51   :  { %128 = vrot.lane.b32.xlu0 %v1973_v2, %s1885_s15 }
  0x53   :  { %154 = vrot.lane.b32.xlu1 %v1985_v6, %s1886_s16 }
  0x55   :  { %138 = vrot.lane.b32.xlu0 %v63_v11, %s1885_s15 }
  0x59   :  { %140 = vrot.lane.b32.xlu0 %v65_v13, %s1885_s15 }
  0x5d   :  { %148 = vrot.lane.b32.xlu0 %v1963_v0, %s1886_s16 }
  0x61   :  { %152 = vrot.lane.b32.xlu0 %v1973_v2, %s1886_s16 }
  0x81   :  { %v238_v16 = vpop.permute.xlu1 %237 }
  0x82   :  { %v2020_v17 = vpop.permute.xlu0 %72 }
  0x85   :  { %v240_v18 = vpop.permute.xlu1 %239 }
  0x89   :  { %v242_v23 = vpop.permute.xlu1 %241 }
  0x8d   :  { %v244_v26 = vpop.permute.xlu1 %243 }
  0x91   :  { %v75_v29 = vpop.permute.xlu1 %74 }
  0x92   :  { %v162_v43 = vsel %vm160_vm1, %v1968_v1, %v75_v29 }
  0x93   :  { %v226_v19 = vpop.permute.xlu0 %225  ;;  %v167_v45 = vsel %vm165_vm2, %v162_v43, %v75_v29 }
  0x94   :  { %v250_v20 = vsel %vm249_vm0, %v226_v19, %v238_v16  ;;  %v172_v47 = vsel %vm170_vm3, %v167_v45, %v75_v29 }
  0x95   :  { %258 = vrot.lane.b32.xlu1 %v250_v20, %s1880_s21  ;;  %v79_v31 = vpop.permute.xlu1 %78 }
  0x96   :  { %v164_v48 = vsel %vm160_vm1, %v1985_v6, %v79_v31 }
  0x97   :  { %v228_v21 = vpop.permute.xlu0 %227  ;;  %v169_v53 = vsel %vm165_vm2, %v164_v48, %v79_v31 }
  0x98   :  { %v251_v22 = vsel %vm249_vm0, %v228_v21, %v240_v18  ;;  %v174_v56 = vsel %vm170_vm3, %v169_v53, %v79_v31 }
  0x99   :  { %260 = vrot.lane.b32.xlu0 %v251_v22, %s1880_s21  ;;  %v87_v33 = vpop.permute.xlu1 %86 }
  0x9a   :  { %v177_v51 = vsel %vm175_vm4, %v172_v47, %v87_v33 }
  0x9b   :  { %v230_v24 = vpop.permute.xlu0 %229  ;;  %v182_v55 = vsel %vm180_vm5, %v177_v51, %v87_v33 }
  0x9c   :  { %v252_v25 = vsel %vm249_vm0, %v230_v24, %v242_v23  ;;  %v187_v59 = vsel %vm185_vm6, %v182_v55, %v87_v33 }
  0x9d   :  { %262 = vrot.lane.b32.xlu0 %v252_v25, %s1880_s21  ;;  %v91_v35 = vpop.permute.xlu1 %90 }
  0x9e   :  { %v179_v61 = vsel %vm175_vm4, %v174_v56, %v91_v35 }
  0x9f   :  { %v232_v27 = vpop.permute.xlu0 %231  ;;  %v184_v3 = vsel %vm180_vm5, %v179_v61, %v91_v35 }
  0xa0   :  { %v253_v28 = vsel %vm249_vm0, %v232_v27, %v244_v26  ;;  %v189_v8 = vsel %vm185_vm6, %v184_v3, %v91_v35  ;;  %vm300_vm0 = vcmask 1043459  }
  0xa1   :  { %264 = vrot.lane.b32.xlu1 %v253_v28, %s1880_s21  ;;  %v99_v37 = vpop.permute.xlu1 %98  ;;  %s1888_s21 = smov 36  }
  0xa2   :  { %v192_v63 = vsel %vm190_vm7, %v187_v59, %v99_v37 }
  0xa3   :  { %v77_v30 = vpop.permute.xlu0 %76 }
  0xa4   :  { %v163_v50 = vsel %vm160_vm1, %v1973_v2, %v77_v30  ;;  %v161_v2 = vsel %vm160_vm1, %v1963_v0, %v2020_v17  ;;  %vm335_vm1 = vcmask 1042434  }
  0xa5   :  { %v2032_v39 = vpop.permute.xlu1 %112  ;;  %v168_v54 = vsel %vm165_vm2, %v163_v50, %v77_v30  ;;  %v166_v6 = vsel %vm165_vm2, %v161_v2, %v2020_v17  ;;  %vm365_vm2 = vcmask 1045509  }
  0xa6   :  { %v173_v58 = vsel %vm170_vm3, %v168_v54, %v77_v30  ;;  %v171_v0 = vsel %vm170_vm3, %v166_v6, %v2020_v17  ;;  %v513_v6 = vld [vmem:[%s2742_s2 + $0x210] sm:$0x3]  ;;  %vm327_vm3 = vcmask 146432  }
  0xa7   :  { %v2026_v32 = vpop.permute.xlu0 %84 }
  0xa8   :  { %v176_v12 = vsel %vm175_vm4, %v171_v0, %v2026_v32  ;;  %v507_v0 = vld [vmem:[%s2742_s2 + $0x1e0] sm:$0xff] }
  0xa9   :  { %v103_v41 = vpop.permute.xlu1 %102  ;;  %v181_v18 = vsel %vm180_vm5, %v176_v12, %v2026_v32 }
  0xaa   :  { %v194_v13 = vsel %vm190_vm7, %v189_v8, %v103_v41  ;;  %v186_v22 = vsel %vm185_vm6, %v181_v18, %v2026_v32  ;;  %v516_v8 = vld [vmem:[%s2742_s2 + $0x228] sm:$0x3] }
  0xab   :  { %v89_v34 = vpop.permute.xlu0 %88  ;;  %1687 = vmatprep.subr.msk.mxu1 %vm441_vm15, %v516_v8 }
  0xac   :  { %v178_v62 = vsel %vm175_vm4, %v173_v58, %v89_v34  ;;  %vm329_vm4 = vcmask 293888  }
  0xad   :  { %v119_v44 = vpop.permute.xlu1 %118  ;;  %v183_v4 = vsel %vm180_vm5, %v178_v62, %v89_v34  ;;  %vm331_vm5 = vcmask 441344  }
  0xae   :  { %v188_v9 = vsel %vm185_vm6, %v183_v4, %v89_v34  ;;  %v199_v19 = vsel %vm195_vm8, %v194_v13, %v119_v44  ;;  %v1682_v34 = vld [vmem:[%s2741_s1] ss:$0 sm:$0xff]  ;;  %v510_v13 = vld [vmem:[%s2742_s2 + $0x1f8] sm:$0xff]  ;;  %vm333_vm6 = vcmask 588800  }
  0xaf   :  { %v2028_v36 = vpop.permute.xlu0 %96  ;;  %v204_v23 = vsel %vm200_vm9, %v199_v19, %v103_v41  ;;  %v1683_v41 = vld [vmem:[%s2741_s1 + $0x1] ss:$0 sm:$0xff]  ;;  %s1887_s1 = smov 18  }
  0xb0   :  { %v191_v25 = vsel %vm190_vm7, %v186_v22, %v2028_v36 }
  0xb1   :  { %v127_v49 = vpop.permute.xlu1 %126  ;;  %v196_v29 = vsel %vm195_vm8, %v191_v25, %v2032_v39 }
  0xb2   :  { %v201_v39 = vsel %vm200_vm9, %v196_v29, %v2028_v36  ;;  %v497_v29 = vld [vmem:[%s2742_s2 + $0x190] sm:$0xff] }
  0xb3   :  { %v2030_v38 = vpop.permute.xlu0 %100 }
  0xb4   :  { %v193_v14 = vsel %vm190_vm7, %v188_v9, %v2030_v38  ;;  %vm443_vm7 = vcmask 1043456  }
  0xb5   :  { %v2051_v57 = vpop.permute.xlu1 %136 }
  0xb7   :  { %v115_v40 = vpop.permute.xlu0 %114 }
  0xb8   :  { %v197_v5 = vsel %vm195_vm8, %v192_v63, %v115_v40 }
  0xb9   :  { %v131_v1 = vpop.permute.xlu1 %130  ;;  %v202_v10 = vsel %vm200_vm9, %v197_v5, %v99_v37  ;;  %v514_v5 = vld [vmem:[%s2742_s2 + $0x218] sm:$0x3] }
  0xba   :  { %v207_v15 = vsel %vm205_vm10, %v202_v10, %v127_v49  ;;  %v209_v28 = vsel %vm205_vm10, %v204_v23, %v131_v1  ;;  %1684 = vmatprep.subr.msk.mxu0 %vm441_vm15, %v514_v5  ;;  %v508_v10 = vld [vmem:[%s2742_s2 + $0x1e8] sm:$0xff]  ;;  %v495_v23 = vld [vmem:[%s2742_s2 + $0x180] sm:$0xff] }
  0xbb   :  { %v117_v42 = vpop.permute.xlu0 %116  ;;  %1685 = vmatpush1.msk.msra.mxu0 %vm441_vm15, %v513_v6  ;;  %v459_v5 = vld [vmem:[%s2742_s2 + $0x60] sm:$0xff]  ;;  %v462_v6 = vld [vmem:[%s2742_s2 + $0x78] sm:$0xff] }
  0xbc   :  { %v198_v17 = vsel %vm195_vm8, %v193_v14, %v117_v42  ;;  %551 = vmatprep.subr.mxu0 %v508_v10  ;;  %v502_v14 = vld [vmem:[%s2742_s2 + $0x1b8] sm:$0xff]  ;;  %vm436_vm8 = vcmask 1046528  }
  0xbd   :  { %v143_v11 = vpop.permute.xlu1 %142  ;;  %v203_v26 = vsel %vm200_vm9, %v198_v17, %v2030_v38  ;;  %552 = vmatpush1.msra.mxu0 %v507_v0  ;;  %v504_v17 = vld [vmem:[%s2742_s2 + $0x1c8] sm:$0xff]  ;;  %v454_v10 = vld [vmem:[%s2742_s2 + $0x38] sm:$0xff]  ;;  %v453_v0 = vld [vmem:[%s2742_s2 + $0x30] sm:$0xff]  ;;  %vm445_vm9 = vcmask 1045504  }
  0xbe   :  { %v214_v37 = vsel %vm210_vm11, %v209_v28, %v143_v11  ;;  %v515_v11 = vld [vmem:[%s2742_s2 + $0x220] sm:$0x3]  ;;  %553 = vmatprep.subr.mxu0 %v502_v14  ;;  %v490_v28 = vld [vmem:[%s2742_s2 + $0x158] sm:$0xff]  ;;  %v456_v14 = vld [vmem:[%s2742_s2 + $0x48] sm:$0xff] }
  0xbf   :  { %v2037_v46 = vpop.permute.xlu0 %124  ;;  %v219_v45 = vsel %vm215_vm12, %v214_v37, %v131_v1  ;;  %1688 = vmatpush1.msk.msra.mxu1 %vm441_vm15, %v515_v11  ;;  %v461_v11 = vld [vmem:[%s2742_s2 + $0x70] sm:$0xff] }
  0xc0   :  { %v206_v42 = vsel %vm205_vm10, %v201_v39, %v2037_v46  ;;  %622 = vmatprep.subr.mxu1 %v510_v13  ;;  %v483_v39 = vld [vmem:[%s2742_s2 + $0x120] sm:$0xff] }
  0xc1   :  { %v151_v21 = vpop.permute.xlu1 %150  ;;  %v211_v36 = vsel %vm210_vm11, %v206_v42, %v2051_v57 }
  0xc2   :  { %v216_v54 = vsel %vm215_vm12, %v211_v36, %v2037_v46  ;;  %v480_v36 = vld [vmem:[%s2742_s2 + $0x108] sm:$0xff] }
  0xc3   :  { %v2045_v52 = vpop.permute.xlu0 %128 }
  0xc4   :  { %v208_v30 = vsel %vm205_vm10, %v203_v26, %v2045_v52  ;;  %vm519_vm10 = vcmask 736256  }
  0xc5   :  { %v155_v32 = vpop.permute.xlu1 %154 }
  0xc7   :  { %v139_v60 = vpop.permute.xlu0 %138 }
  0xc8   :  { %v212_v20 = vsel %vm210_vm11, %v207_v15, %v139_v60  ;;  %v509_v15 = vld [vmem:[%s2742_s2 + $0x1f0] sm:$0xff] }
  0xc9   :  { %v217_v27 = vsel %vm215_vm12, %v212_v20, %v127_v49  ;;  %v224_v49 = vsel %vm220_vm13, %v219_v45, %v155_v32  ;;  %623 = vmatpush1.msra.mxu1 %v509_v15  ;;  %v496_v20 = vld [vmem:[%s2742_s2 + $0x188] sm:$0xff]  ;;  %v485_v45 = vld [vmem:[%s2742_s2 + $0x130] sm:$0xff] }
  0xca   :  { %v222_v31 = vsel %vm220_vm13, %v217_v27, %v151_v21  ;;  %v503_v21 = vld [vmem:[%s2742_s2 + $0x1c0] sm:$0xff]  ;;  %624 = vmatprep.subr.mxu1 %v504_v17  ;;  %v492_v32 = vld [vmem:[%s2742_s2 + $0x168] sm:$0xff] }
  0xcb   :  { %v141_v7 = vpop.permute.xlu0 %140  ;;  %625 = vmatpush1.msra.mxu1 %v503_v21  ;;  %v448_v15 = vld [vmem:[%s2742_s2 + $0x8] sm:$0xff]  ;;  %v447_v17 = vld [vmem:[%s2742_s2] sm:$0xff] }
  0xcc   :  { %v213_v40 = vsel %vm210_vm11, %v208_v30, %v141_v7  ;;  %v489_v30 = vld [vmem:[%s2742_s2 + $0x150] sm:$0xff] }
  0xcd   :  { %v218_v47 = vsel %vm215_vm12, %v213_v40, %v2045_v52  ;;  %v486_v40 = vld [vmem:[%s2742_s2 + $0x138] sm:$0xff]  ;;  %vm1026_vm12 = vcmask 310272  }
  0xcf   :  { %v149_v16 = vpop.permute.xlu0 %148 }
  0xd0   :  { %v221_v52 = vsel %vm220_vm13, %v216_v54, %v149_v16  ;;  %v501_v16 = vld [vmem:[%s2742_s2 + $0x1b0] sm:$0xff]  ;;  %v471_v54 = vld [vmem:[%s2742_s2 + $0xc0] sm:$0xff] }
  0xd1   :  { %554 = vmatpush1.msra.mxu0 %v501_v16  ;;  %v455_v16 = vld [vmem:[%s2742_s2 + $0x40] sm:$0xff] }
  0xd2   :  { %555 = vmatprep.subr.mxu0 %v496_v20  ;;  %v450_v20 = vld [vmem:[%s2742_s2 + $0x18] sm:$0xff] }
  0xd3   :  { %v153_v24 = vpop.permute.xlu0 %152  ;;  %556 = vmatpush1.msra.mxu0 %v495_v23  ;;  %v449_v23 = vld [vmem:[%s2742_s2 + $0x10] sm:$0xff] }
  0xd4   :  { %v223_v51 = vsel %vm220_vm13, %v218_v47, %v153_v24  ;;  %v498_v24 = vld [vmem:[%s2742_s2 + $0x198] sm:$0xff]  ;;  %557 = vmatprep.subr.mxu0 %v490_v28  ;;  %v477_v47 = vld [vmem:[%s2742_s2 + $0xf0] sm:$0xff]  ;;  %vm1894_vm13 = vmmov 0  }
  0xd5   :  { %626 = vmatprep.subr.mxu1 %v498_v24  ;;  %558 = vmatpush1.msra.mxu0 %v489_v30  ;;  %v518_v24 = vld [vmem:[%s2742_s2 + $0x238] sm:$0x3] }
  0xd6   :  { %627 = vmatpush1.msra.mxu1 %v497_v29 }
  0xd7   :  { %628 = vmatprep.subr.mxu1 %v492_v32 }
 0x107   :  { %v259_v43 = vpop.permute.xlu1 %258 }
 0x108   :  { %v271_v58 = vsel %vm270_vm14, %v221_v52, %v259_v43  ;;  %v474_v52 = vld [vmem:[%s2742_s2 + $0xd8] sm:$0xff] }
 0x109   :  { %v280_v60 = vmul.f32 %v1682_v34, %v271_v58  ;;  %v466_v58 = vld [vmem:[%s2742_s2 + $0x98] sm:$0xff] }
 0x10b   :  { %v261_v33 = vpop.permute.xlu0 %260  ;;  %v289_v63 = vadd.f32 %v1683_v41, %v280_v60 }
 0x10c   :  { %v272_v35 = vsel %vm270_vm14, %v222_v31, %v261_v33  ;;  %v484_v33 = vld [vmem:[%s2742_s2 + $0x128] sm:$0xff] }
 0x10d   :  { %v281_v38 = vmul.f32 %v1682_v34, %v272_v35  ;;  %559 = vmatprep.subr.mxu0 %v484_v33 }
 0x10e   :  { %560 = vmatpush1.msra.mxu0 %v483_v39 }
 0x10f   :  { %v290_v44 = vadd.f32 %v1683_v41, %v281_v38  ;;  %v263_v48 = vpop.permute.xlu0 %262 }
 0x110   :  { %v273_v55 = vsel %vm270_vm14, %v223_v51, %v263_v48  ;;  %v472_v51 = vld [vmem:[%s2742_s2 + $0xc8] sm:$0xff] }
 0x111   :  { %1818 = vtanh.f32 %v290_v44  ;;  %v282_v57 = vmul.f32 %v1682_v34, %v273_v55 }
 0x113   :  { %v265_v50 = vpop.permute.xlu1 %264  ;;  %v291_v61 = vadd.f32 %v1683_v41, %v282_v57 }
 0x114   :  { %v274_v53 = vsel %vm270_vm14, %v224_v49, %v265_v50  ;;  %vm1528_vm14 = vcmask 523264  }
 0x115   :  { %v283_v56 = vmul.f32 %v1682_v34, %v274_v53  ;;  %v491_v34 = vld [vmem:[%s2742_s2 + $0x160] sm:$0xff] }
 0x116   :  { %629 = vmatpush1.msra.mxu1 %v491_v34  ;;  %v479_v53 = vld [vmem:[%s2742_s2 + $0x100] sm:$0xff] }
 0x117   :  { %v292_v59 = vadd.f32 %v1683_v41, %v283_v56  ;;  %v478_v41 = vld [vmem:[%s2742_s2 + $0xf8] sm:$0xff]  ;;  %630 = vmatprep.subr.mxu1 %v486_v40 }
 0x118   :  { %561 = vmatprep.subr.mxu0 %v478_v41  ;;  %631 = vmatpush1.msra.mxu1 %v485_v45 }
 0x119   :  { %1820 = vtanh.f32 %v292_v59  ;;  %562 = vmatpush1.msra.mxu0 %v477_v47  ;;  %632 = vmatprep.subr.mxu1 %v480_v36  ;;  %v473_v59 = vld [vmem:[%s2742_s2 + $0xd0] sm:$0xff] }
 0x11a   :  { %1822 = vtanh.f32 %v291_v61  ;;  %563 = vmatprep.subr.mxu0 %v472_v51  ;;  %633 = vmatpush1.msra.mxu1 %v479_v53  ;;  %v465_v61 = vld [vmem:[%s2742_s2 + $0x90] sm:$0xff] }
 0x11b   :  { %1824 = vtanh.f32 %v289_v63  ;;  %564 = vmatpush1.msra.mxu0 %v471_v54  ;;  %634 = vmatprep.subr.mxu1 %v474_v52  ;;  %v468_v63 = vld [vmem:[%s2742_s2 + $0xa8] sm:$0xff] }
 0x11c   :  { %565 = vmatprep.subr.mxu0 %v466_v58  ;;  %635 = vmatpush1.msra.mxu1 %v473_v59 }
 0x11d   :  { %566 = vmatpush1.msra.mxu0 %v465_v61  ;;  %636 = vmatprep.subr.mxu1 %v468_v63 }
 0x11e   :  { %v2122_v62 = vpop.eup %1818 }
 0x11f   :  { %v303_v1 = vrot.slane %v2122_v62, 1  ;;  %v398_v46 = vrot.slane %v2122_v62, 2  ;;  %v380_v12 = vrot.slane %v2122_v62, 4  ;;  %v406_v19 = vrot.slane %v2122_v62, 3 }
 0x121   :  { %392 = vrot.lane.b32.xlu0 %v303_v1, %s1887_s1 }
 0x125   :  { %400 = vrot.lane.b32.xlu0 %v398_v46, %s1888_s21 }
 0x126   :  { %v2128_v2 = vpop.eup %1820 }
 0x127   :  { %394 = vrot.lane.b32.xlu1 %v2128_v2, %s1887_s1  ;;  %v407_v3 = vrot.slane %v2128_v2, 2  ;;  %v299_v4 = vrot.slane %v2128_v2, 7  ;;  %v399_v7 = vrot.slane %v2128_v2, 1  ;;  %v2176_v18 = vpop.eup %1822  ;;  %v304_v25 = vsel %vm300_vm0, %v2128_v2, %v303_v1  ;;  %v460_v1 = vld [vmem:[%s2742_s2 + $0x68] sm:$0xff] }
 0x128   :  { %v2191_v22 = vpop.eup %1824  ;;  %v311_v26 = vrot.slane %v2176_v18, 5  ;;  %v381_v27 = vrot.slane %v2128_v2, 3  ;;  %v317_v38 = vrot.slane %v2176_v18, 6  ;;  %v344_v44 = vrot.slane %v2176_v18, 1  ;;  %567 = vmatprep.subr.mxu0 %v460_v1 }
 0x129   :  { %410 = vrot.lane.b32.xlu0 %v407_v3, %s1889_s26  ;;  %v2148_v9 = vsel %vm300_vm0, %v299_v4, %v2122_v62  ;;  %v310_v31 = vrot.slane %v2191_v22, 6  ;;  %v338_v37 = vrot.slane %v2191_v22, 1  ;;  %v316_v43 = vrot.slane %v2191_v22, 7  ;;  %v467_v4 = vld [vmem:[%s2742_s2 + $0xa0] sm:$0xff]  ;;  %568 = vmatpush1.msra.mxu0 %v459_v5 }
 0x12a   :  { %v343_v49 = vrot.slane %v2191_v22, 2  ;;  %v2257_v50 = vrot.slane %v2176_v18, 7  ;;  %v350_v56 = vrot.slane %v2176_v18, 2  ;;  %v349_v60 = vrot.slane %v2191_v22, 3  ;;  %637 = vmatpush1.msra.mxu1 %v467_v4  ;;  %569 = vmatprep.subr.mxu0 %v454_v10 }
 0x12b   :  { %402 = vrot.lane.b32.xlu1 %v399_v7, %s1888_s21  ;;  %v312_v35 = vsel %vm300_vm0, %v311_v26, %v310_v31  ;;  %v339_v42 = vsel %vm335_vm1, %v2176_v18, %v338_v37  ;;  %v318_v48 = vsel %vm300_vm0, %v317_v38, %v316_v43  ;;  %v356_v3 = vrot.slane %v2176_v18, 3  ;;  %638 = vmatprep.subr.mxu1 %v462_v6  ;;  %v887_v26 = vld [vmem:[#allocation2 + $0xf8] sm:$0xff] }
 0x12c   :  { %v345_v55 = vsel %vm335_vm1, %v344_v44, %v343_v49  ;;  %v323_v57 = vsel %vm300_vm0, %v2257_v50, %v2191_v22  ;;  %v351_v46 = vsel %vm335_vm1, %v350_v56, %v349_v60  ;;  %v368_v7 = vsel %vm365_vm2, %v2176_v18, %v338_v37  ;;  %639 = vmatpush1.msra.mxu1 %v461_v11  ;;  %v517_v11 = vld [vmem:[%s2742_s2 + $0x230] sm:$0x3] }
 0x12d   :  { %414 = vrot.lane.b32.xlu0 %v380_v12, %s1890_s23  ;;  %v355_v8 = vrot.slane %v2191_v22, 4  ;;  %570 = vmatpush1.msra.mxu0 %v453_v0  ;;  %v372_v21 = vsel %vm365_vm2, %v344_v44, %v343_v49  ;;  %v382_v18 = vsel %vm365_vm2, %v381_v27, %v380_v12  ;;  %vm1641_vm0 = vcmask 730624  }
 0x12e   :  { %640 = vmatprep.subr.mxu1 %v456_v14  ;;  %571 = vmatprep.subr.mxu0 %v448_v15  ;;  %v886_v14 = vld [vmem:[#allocation2 + $0xf0] sm:$0xff]  ;;  %v511_v15 = vld [vmem:[%s2742_s2 + $0x200] sm:$0xff] }
 0x12f   :  { %408 = vrot.lane.b32.xlu1 %v406_v19, %s1889_s26  ;;  %v357_v13 = vsel %vm335_vm1, %v356_v3, %v355_v8  ;;  %v376_v19 = vsel %vm365_vm2, %v350_v56, %v349_v60  ;;  %641 = vmatpush1.msra.mxu1 %v455_v16  ;;  %v366_v60 = vsel %vm365_vm2, %v2257_v50, %v2191_v22  ;;  %v885_v16 = vld [vmem:[#allocation2 + $0xe8] sm:$0xff] }
 0x130   :  { %572 = vmatpush1.msra.mxu0 %v447_v17  ;;  %642 = vmatprep.subr.mxu1 %v450_v20  ;;  %v884_v17 = vld [vmem:[#allocation2 + $0xe0] sm:$0xff]  ;;  %v505_v20 = vld [vmem:[%s2742_s2 + $0x1d0] sm:$0xff] }
 0x131   :  { %305 = vrot.lane.b32.xlu0 %v304_v25, %s1887_s1  ;;  %v1891_v25 = vmov 0.0   ;;  %643 = vmatpush1.msra.mxu1 %v449_v23  ;;  %v500_v23 = vld [vmem:[%s2742_s2 + $0x1a8] sm:$0xff] }
 0x132   :  { %605 = vmatprep.mubr.f32.mxu0 %v1891_v25  ;;  %676 = vmatprep.mubr.f32.mxu1 %v1891_v25 }
 0x133   :  { %416 = vrot.lane.b32.xlu1 %v381_v27, %s1890_s23  ;;  %1690 = vmatprep.subr.msk.mxu0 %vm441_vm15, %v518_v24  ;;  %v882_v24 = vld [vmem:[#allocation2 + $0xd0] sm:$0xff] }
 0x134   :  { %1036 = vmatprep.subr.mxu1 %v887_v26  ;;  %v881_v26 = vld [vmem:[#allocation2 + $0xc8] sm:$0xff] }
 0x135   :  { %313 = vrot.lane.b32.xlu0 %v312_v35, %s1888_s21 }
 0x137   :  { %340 = vrot.lane.b32.xlu1 %v339_v42, %s1887_s1  ;;  %v336_v42 = vsel %vm335_vm1, %v2257_v50, %v2191_v22  ;;  %vm1652_vm1 = vcmask 205824  }
 0x139   :  { %319 = vrot.lane.b32.xlu0 %v318_v48, %s1889_s26 }
 0x13b   :  { %346 = vrot.lane.b32.xlu1 %v345_v55, %s1888_s21 }
 0x13d   :  { %324 = vrot.lane.b32.xlu0 %v323_v57, %s1890_s23 }
 0x13f   :  { %352 = vrot.lane.b32.xlu1 %v351_v46, %s1889_s26 }
 0x141   :  { %369 = vrot.lane.b32.xlu0 %v368_v7, %s1887_s1 }
 0x143   :  { %358 = vrot.lane.b32.xlu1 %v357_v13, %s1890_s23  ;;  %v512_v13 = vld [vmem:[%s2742_s2 + $0x208] sm:$0xff] }
 0x145   :  { %377 = vrot.lane.b32.xlu0 %v376_v19, %s1889_s26  ;;  %v506_v19 = vld [vmem:[%s2742_s2 + $0x1d8] sm:$0xff] }
 0x147   :  { %373 = vrot.lane.b32.xlu1 %v372_v21, %s1888_s21  ;;  %v883_v21 = vld [vmem:[#allocation2 + $0xd8] sm:$0xff]  ;;  %s1893_s21 = smov 64  }
 0x14b   :  { %383 = vrot.lane.b32.xlu1 %v382_v18, %s1890_s23  ;;  %v499_v18 = vld [vmem:[%s2742_s2 + $0x1a0] sm:$0xff] }
 0x193   :  { %v393_v28 = vpop.permute.xlu0 %392 }
 0x194   :  { %v420_v48 = vsel %vm327_vm3, %v2191_v22, %v393_v28  ;;  %v494_v28 = vld [vmem:[%s2742_s2 + $0x178] sm:$0xff] }
 0x197   :  { %v401_v29 = vpop.permute.xlu0 %400 }
 0x198   :  { %v422_v53 = vsel %vm329_vm4, %v420_v48, %v401_v29  ;;  %v880_v29 = vld [vmem:[#allocation2 + $0xc0] sm:$0xff]  ;;  %v458_v48 = vld [vmem:[%s2742_s2 + $0x58] sm:$0xff] }
 0x199   :  { %v395_v30 = vpop.permute.xlu1 %394 }
 0x19a   :  { %v421_v43 = vsel %vm327_vm3, %v2257_v50, %v395_v30  ;;  %v493_v30 = vld [vmem:[%s2742_s2 + $0x170] sm:$0xff] }
 0x19b   :  { %v411_v31 = vpop.permute.xlu0 %410 }
 0x19d   :  { %v403_v32 = vpop.permute.xlu1 %402 }
 0x19e   :  { %v423_v47 = vsel %vm329_vm4, %v421_v43, %v403_v32  ;;  %v488_v32 = vld [vmem:[%s2742_s2 + $0x148] sm:$0xff]  ;;  %v469_v43 = vld [vmem:[%s2742_s2 + $0xb0] sm:$0xff] }
 0x19f   :  { %v415_v33 = vpop.permute.xlu0 %414  ;;  %v425_v52 = vsel %vm331_vm5, %v423_v47, %v411_v31  ;;  %v879_v31 = vld [vmem:[#allocation2 + $0xb8] sm:$0xff]  ;;  %v870_v47 = vld [vmem:[#allocation2 + $0x70] sm:$0xff] }
 0x1a1   :  { %v409_v34 = vpop.permute.xlu1 %408 }
 0x1a2   :  { %v424_v56 = vsel %vm331_vm5, %v422_v53, %v409_v34  ;;  %v487_v34 = vld [vmem:[%s2742_s2 + $0x140] sm:$0xff]  ;;  %v867_v53 = vld [vmem:[#allocation2 + $0x58] sm:$0xff] }
 0x1a3   :  { %v306_v35 = vpop.permute.xlu0 %305  ;;  %v426_v46 = vsel %vm333_vm6, %v424_v56, %v415_v33  ;;  %v878_v33 = vld [vmem:[#allocation2 + $0xb0] sm:$0xff]  ;;  %v451_v56 = vld [vmem:[%s2742_s2 + $0x20] sm:$0xff] }
 0x1a4   :  { %v328_v27 = vsel %vm327_vm3, %v2148_v9, %v306_v35  ;;  %v437_v6 = vrot.slane %v426_v46, 1  ;;  %v877_v35 = vld [vmem:[#allocation2 + $0xa8] sm:$0xff]  ;;  %v947_v46 = vld [vmem:[#allocation2 + $0x2d8] sm:$0xff] }
 0x1a5   :  { %v417_v37 = vpop.permute.xlu1 %416 }
 0x1a6   :  { %v427_v57 = vsel %vm333_vm6, %v425_v52, %v417_v37  ;;  %v482_v37 = vld [vmem:[%s2742_s2 + $0x118] sm:$0xff]  ;;  %v865_v52 = vld [vmem:[#allocation2 + $0x48] sm:$0xff] }
 0x1a7   :  { %v314_v62 = vpop.permute.xlu0 %313  ;;  %v438_v4 = vrot.slane %v427_v57, 1  ;;  %v864_v57 = vld [vmem:[#allocation2 + $0x40] sm:$0xff] }
 0x1a8   :  { %v330_v41 = vsel %vm329_vm4, %v328_v27, %v314_v62  ;;  %v876_v62 = vld [vmem:[#allocation2 + $0xa0] sm:$0xff] }
 0x1a9   :  { %v341_v38 = vpop.permute.xlu1 %340  ;;  %v439_v10 = vsel %vm436_vm8, %v437_v6, %v438_v4  ;;  %v475_v27 = vld [vmem:[%s2742_s2 + $0xe0] sm:$0xff]  ;;  %v946_v4 = vld [vmem:[#allocation2 + $0x2d0] sm:$0xff]  ;;  %v945_v6 = vld [vmem:[#allocation2 + $0x2c8] sm:$0xff] }
 0x1aa   :  { %v361_v44 = vsel %vm327_vm3, %v336_v42, %v341_v38  ;;  %v481_v38 = vld [vmem:[%s2742_s2 + $0x110] sm:$0xff]  ;;  %v872_v42 = vld [vmem:[#allocation2 + $0x80] sm:$0xff] }
 0x1ab   :  { %v320_v2 = vpop.permute.xlu0 %319 }
 0x1ac   :  { %v332_v45 = vsel %vm331_vm5, %v330_v41, %v320_v2  ;;  %v875_v2 = vld [vmem:[#allocation2 + $0x98] sm:$0xff] }
 0x1ad   :  { %v347_v39 = vpop.permute.xlu1 %346  ;;  %v470_v41 = vld [vmem:[%s2742_s2 + $0xb8] sm:$0xff] }
 0x1ae   :  { %v362_v9 = vsel %vm329_vm4, %v361_v44, %v347_v39  ;;  %v476_v39 = vld [vmem:[%s2742_s2 + $0xe8] sm:$0xff]  ;;  %v871_v44 = vld [vmem:[#allocation2 + $0x78] sm:$0xff] }
 0x1af   :  { %v325_v12 = vpop.permute.xlu0 %324 }
 0x1b0   :  { %v334_v36 = vsel %vm333_vm6, %v332_v45, %v325_v12  ;;  %v874_v12 = vld [vmem:[#allocation2 + $0x90] sm:$0xff]  ;;  %v464_v45 = vld [vmem:[%s2742_s2 + $0x88] sm:$0xff] }
 0x1b1   :  { %v353_v40 = vpop.permute.xlu1 %352  ;;  %v429_v58 = vrot.slane %v334_v36, 2  ;;  %v869_v36 = vld [vmem:[#allocation2 + $0x68] sm:$0xff] }
 0x1b2   :  { %v363_v49 = vsel %vm331_vm5, %v362_v9, %v353_v40  ;;  %v873_v40 = vld [vmem:[#allocation2 + $0x88] sm:$0xff]  ;;  %v463_v9 = vld [vmem:[%s2742_s2 + $0x80] sm:$0xff] }
 0x1b3   :  { %v370_v54 = vpop.permute.xlu0 %369 }
 0x1b4   :  { %v386_v61 = vsel %vm327_vm3, %v366_v60, %v370_v54  ;;  %v452_v54 = vld [vmem:[%s2742_s2 + $0x28] sm:$0xff] }
 0x1b5   :  { %v359_v51 = vpop.permute.xlu1 %358  ;;  %v949_v60 = vld [vmem:[#allocation2 + $0x2e8] sm:$0xff] }
 0x1b6   :  { %v364_v55 = vsel %vm333_vm6, %v363_v49, %v359_v51  ;;  %v868_v49 = vld [vmem:[#allocation2 + $0x60] sm:$0xff]  ;;  %v457_v51 = vld [vmem:[%s2742_s2 + $0x50] sm:$0xff] }
 0x1b7   :  { %v432_v59 = vrot.slane %v364_v55, 7  ;;  %v378_v5 = vpop.permute.xlu0 %377  ;;  %v866_v55 = vld [vmem:[#allocation2 + $0x50] sm:$0xff] }
 0x1b9   :  { %v374_v63 = vpop.permute.xlu1 %373  ;;  %v442_v1 = vsel %vm441_vm15, %v429_v58, %v432_v59  ;;  %v951_v58 = vld [vmem:[#allocation2 + $0x2f8] sm:$0xff]  ;;  %v950_v59 = vld [vmem:[#allocation2 + $0x2f0] sm:$0xff] }
 0x1ba   :  { %v387_v3 = vsel %vm329_vm4, %v386_v61, %v374_v63  ;;  %v863_v61 = vld [vmem:[#allocation2 + $0x38] sm:$0xff]  ;;  %v948_v63 = vld [vmem:[#allocation2 + $0x2e0] sm:$0xff] }
 0x1bb   :  { %v388_v8 = vsel %vm331_vm5, %v387_v3, %v378_v5  ;;  %v861_v3 = vld [vmem:[#allocation2 + $0x28] sm:$0xff]  ;;  %v860_v5 = vld [vmem:[#allocation2 + $0x20] sm:$0xff] }
 0x1bd   :  { %v384_v7 = vpop.permute.xlu1 %383 }
 0x1be   :  { %v389_v22 = vsel %vm333_vm6, %v388_v8, %v384_v7  ;;  %v859_v7 = vld [vmem:[#allocation2 + $0x18] sm:$0xff]  ;;  %v944_v8 = vld [vmem:[#allocation2 + $0x2c0] sm:$0xff] }
 0x1bf   :  { %v444_v50 = vsel %vm443_vm7, %v442_v1, %v389_v22  ;;  %v862_v1 = vld [vmem:[#allocation2 + $0x30] sm:$0xff] }
 0x1c0   :  { %v2395_v0 = vsel %vm445_vm9, %v444_v50, %v439_v10  ;;  %v858_v22 = vld [vmem:[#allocation2 + $0x10] sm:$0xff]  ;;  %v943_v50 = vld [vmem:[#allocation2 + $0x2b8] sm:$0xff]  ;;  %v857_v10 = vld [vmem:[#allocation2 + $0x8] sm:$0xff] }
 0x1c1   :  { %1686 = vmatmul.mubr.msk.f32.vlgmr.msra.gmra.mxu0 %vm519_vm10, %v2395_v0  ;;  %1689 = vmatmul.mubr.msk.f32.vlgmr.msra.gmra.mxu1 %vm519_vm10, %v2395_v0 }
 0x1c2   :  { %1691 = vmatpush1.msk.msra.mxu0 %vm441_vm15, %v517_v11  ;;  %747 = vmatprep.mubr.f32.mxu0 %v1891_v25  ;;  %v942_v11 = vld [vmem:[#allocation2 + $0x2b0] sm:$0xff] }
 0x1c3   :  { %693 = vmatprep.subr.mxu0 %v512_v13  ;;  %1037 = vmatpush1.msra.mxu1 %v886_v14  ;;  %v941_v13 = vld [vmem:[#allocation2 + $0x2a8] sm:$0xff]  ;;  %v919_v14 = vld [vmem:[#allocation2 + $0x1f8] sm:$0xff] }
 0x1c4   :  { %694 = vmatpush1.msra.mxu0 %v511_v15  ;;  %1038 = vmatprep.subr.mxu1 %v885_v16  ;;  %v940_v15 = vld [vmem:[#allocation2 + $0x2a0] sm:$0xff]  ;;  %v918_v16 = vld [vmem:[#allocation2 + $0x1f0] sm:$0xff] }
 0x1c5   :  { %695 = vmatprep.subr.mxu0 %v506_v19  ;;  %1039 = vmatpush1.msra.mxu1 %v884_v17  ;;  %v939_v19 = vld [vmem:[#allocation2 + $0x298] sm:$0xff]  ;;  %v917_v17 = vld [vmem:[#allocation2 + $0x1e8] sm:$0xff] }
 0x1c6   :  { %696 = vmatpush1.msra.mxu0 %v505_v20  ;;  %1040 = vmatprep.subr.mxu1 %v883_v21  ;;  %v938_v20 = vld [vmem:[#allocation2 + $0x290] sm:$0xff]  ;;  %v916_v21 = vld [vmem:[#allocation2 + $0x1e0] sm:$0xff] }
 0x1c7   :  { %697 = vmatprep.subr.mxu0 %v500_v23  ;;  %1041 = vmatpush1.msra.mxu1 %v882_v24  ;;  %v937_v23 = vld [vmem:[#allocation2 + $0x288] sm:$0xff]  ;;  %v915_v24 = vld [vmem:[#allocation2 + $0x1d8] sm:$0xff] }
 0x1c8   :  { %698 = vmatpush1.msra.mxu0 %v499_v18  ;;  %1042 = vmatprep.subr.mxu1 %v881_v26  ;;  %v936_v18 = vld [vmem:[#allocation2 + $0x280] sm:$0xff]  ;;  %v914_v26 = vld [vmem:[#allocation2 + $0x1d0] sm:$0xff] }
 0x1c9   :  { %699 = vmatprep.subr.mxu0 %v494_v28  ;;  %1043 = vmatpush1.msra.mxu1 %v880_v29  ;;  %v935_v28 = vld [vmem:[#allocation2 + $0x278] sm:$0xff]  ;;  %v913_v29 = vld [vmem:[#allocation2 + $0x1c8] sm:$0xff] }
 0x1ca   :  { %700 = vmatpush1.msra.mxu0 %v493_v30  ;;  %1044 = vmatprep.subr.mxu1 %v879_v31  ;;  %v934_v30 = vld [vmem:[#allocation2 + $0x270] sm:$0xff]  ;;  %v912_v31 = vld [vmem:[#allocation2 + $0x1c0] sm:$0xff] }
 0x1cb   :  { %701 = vmatprep.subr.mxu0 %v488_v32  ;;  %1045 = vmatpush1.msra.mxu1 %v878_v33  ;;  %v933_v32 = vld [vmem:[#allocation2 + $0x268] sm:$0xff]  ;;  %v911_v33 = vld [vmem:[#allocation2 + $0x1b8] sm:$0xff] }
 0x1cc   :  { %702 = vmatpush1.msra.mxu0 %v487_v34  ;;  %1046 = vmatprep.subr.mxu1 %v877_v35  ;;  %v932_v34 = vld [vmem:[#allocation2 + $0x260] sm:$0xff]  ;;  %v910_v35 = vld [vmem:[#allocation2 + $0x1b0] sm:$0xff] }
 0x1cd   :  { %703 = vmatprep.subr.mxu0 %v482_v37  ;;  %1047 = vmatpush1.msra.mxu1 %v876_v62  ;;  %v931_v37 = vld [vmem:[#allocation2 + $0x258] sm:$0xff]  ;;  %v909_v62 = vld [vmem:[#allocation2 + $0x1a8] sm:$0xff] }
 0x1ce   :  { %704 = vmatpush1.msra.mxu0 %v481_v38  ;;  %1048 = vmatprep.subr.mxu1 %v875_v2  ;;  %v930_v38 = vld [vmem:[#allocation2 + $0x250] sm:$0xff]  ;;  %v908_v2 = vld [vmem:[#allocation2 + $0x1a0] sm:$0xff] }
 0x1cf   :  { %705 = vmatprep.subr.mxu0 %v476_v39  ;;  %1049 = vmatpush1.msra.mxu1 %v874_v12  ;;  %v929_v39 = vld [vmem:[#allocation2 + $0x248] sm:$0xff]  ;;  %v907_v12 = vld [vmem:[#allocation2 + $0x198] sm:$0xff] }
 0x1d0   :  { %706 = vmatpush1.msra.mxu0 %v475_v27  ;;  %1050 = vmatprep.subr.mxu1 %v873_v40  ;;  %v928_v27 = vld [vmem:[#allocation2 + $0x240] sm:$0xff]  ;;  %v906_v40 = vld [vmem:[#allocation2 + $0x190] sm:$0xff] }
 0x1d1   :  { %707 = vmatprep.subr.mxu0 %v470_v41  ;;  %1051 = vmatpush1.msra.mxu1 %v872_v42  ;;  %v927_v41 = vld [vmem:[#allocation2 + $0x238] sm:$0xff]  ;;  %v905_v42 = vld [vmem:[#allocation2 + $0x188] sm:$0xff] }
 0x1d2   :  { %708 = vmatpush1.msra.mxu0 %v469_v43  ;;  %1052 = vmatprep.subr.mxu1 %v871_v44  ;;  %v926_v43 = vld [vmem:[#allocation2 + $0x230] sm:$0xff]  ;;  %v904_v44 = vld [vmem:[#allocation2 + $0x180] sm:$0xff] }
 0x1d3   :  { %709 = vmatprep.subr.mxu0 %v464_v45  ;;  %1053 = vmatpush1.msra.mxu1 %v870_v47  ;;  %v925_v45 = vld [vmem:[#allocation2 + $0x228] sm:$0xff]  ;;  %v903_v47 = vld [vmem:[#allocation2 + $0x178] sm:$0xff] }
 0x1d4   :  { %710 = vmatpush1.msra.mxu0 %v463_v9  ;;  %1054 = vmatprep.subr.mxu1 %v869_v36  ;;  %v924_v9 = vld [vmem:[#allocation2 + $0x220] sm:$0xff]  ;;  %v902_v36 = vld [vmem:[#allocation2 + $0x170] sm:$0xff] }
 0x1d5   :  { %711 = vmatprep.subr.mxu0 %v458_v48  ;;  %1055 = vmatpush1.msra.mxu1 %v868_v49  ;;  %v923_v48 = vld [vmem:[#allocation2 + $0x218] sm:$0xff]  ;;  %v901_v49 = vld [vmem:[#allocation2 + $0x168] sm:$0xff] }
 0x1d6   :  { %712 = vmatpush1.msra.mxu0 %v457_v51  ;;  %1056 = vmatprep.subr.mxu1 %v867_v53  ;;  %v922_v51 = vld [vmem:[#allocation2 + $0x210] sm:$0xff]  ;;  %v900_v53 = vld [vmem:[#allocation2 + $0x160] sm:$0xff] }
 0x1d7   :  { %713 = vmatprep.subr.mxu0 %v452_v54  ;;  %1057 = vmatpush1.msra.mxu1 %v866_v55  ;;  %v921_v54 = vld [vmem:[#allocation2 + $0x208] sm:$0xff]  ;;  %v899_v55 = vld [vmem:[#allocation2 + $0x158] sm:$0xff] }
 0x1d8   :  { %714 = vmatpush1.msra.mxu0 %v451_v56  ;;  %1058 = vmatprep.subr.mxu1 %v865_v52  ;;  %v920_v56 = vld [vmem:[#allocation2 + $0x200] sm:$0xff]  ;;  %v898_v52 = vld [vmem:[#allocation2 + $0x150] sm:$0xff] }
 0x1d9   :  { %1692 = vmatmul.mubr.msk.f32.vlgmr.msra.gmra.mxu0 %vm519_vm10, %v2395_v0  ;;  %1107 = vmatprep.subr.mxu0 %v951_v58  ;;  %v856_v0 = vld [vmem:[#allocation2] sm:$0xff]  ;;  %v983_v58 = vld [vmem:[#allocation2 + $0x3f8] sm:$0xff] }
 0x1da   :  { %1108 = vmatpush1.msra.mxu0 %v950_v59  ;;  %1059 = vmatpush1.msra.mxu1 %v864_v57  ;;  %v897_v59 = vld [vmem:[#allocation2 + $0x148] sm:$0xff]  ;;  %v982_v57 = vld [vmem:[#allocation2 + $0x3f0] sm:$0xff] }
 0x1db   :  { %1109 = vmatprep.subr.mxu0 %v949_v60  ;;  %1060 = vmatprep.subr.mxu1 %v863_v61  ;;  %v981_v60 = vld [vmem:[#allocation2 + $0x3e8] sm:$0xff]  ;;  %v980_v61 = vld [vmem:[#allocation2 + $0x3e0] sm:$0xff] }
 0x1dc   :  { %1110 = vmatpush1.msra.mxu0 %v948_v63  ;;  %1061 = vmatpush1.msra.mxu1 %v862_v1  ;;  %v979_v63 = vld [vmem:[#allocation2 + $0x3d8] sm:$0xff]  ;;  %v978_v1 = vld [vmem:[#allocation2 + $0x3d0] sm:$0xff] }
 0x1dd   :  { %1111 = vmatprep.subr.mxu0 %v947_v46  ;;  %1062 = vmatprep.subr.mxu1 %v861_v3  ;;  %v977_v46 = vld [vmem:[#allocation2 + $0x3c8] sm:$0xff]  ;;  %v976_v3 = vld [vmem:[#allocation2 + $0x3c0] sm:$0xff] }
 0x1de   :  { %1112 = vmatpush1.msra.mxu0 %v946_v4  ;;  %1063 = vmatpush1.msra.mxu1 %v860_v5  ;;  %v975_v4 = vld [vmem:[#allocation2 + $0x3b8] sm:$0xff]  ;;  %v974_v5 = vld [vmem:[#allocation2 + $0x3b0] sm:$0xff] }
 0x1df   :  { %1113 = vmatprep.subr.mxu0 %v945_v6  ;;  %1064 = vmatprep.subr.mxu1 %v859_v7  ;;  %v973_v6 = vld [vmem:[#allocation2 + $0x3a8] sm:$0xff]  ;;  %v972_v7 = vld [vmem:[#allocation2 + $0x3a0] sm:$0xff] }
 0x1e0   :  { %1114 = vmatpush1.msra.mxu0 %v944_v8  ;;  %1065 = vmatpush1.msra.mxu1 %v858_v22  ;;  %v971_v8 = vld [vmem:[#allocation2 + $0x398] sm:$0xff]  ;;  %v970_v22 = vld [vmem:[#allocation2 + $0x390] sm:$0xff] }
 0x1e1   :  { %1115 = vmatprep.subr.mxu0 %v943_v50  ;;  %1066 = vmatprep.subr.mxu1 %v857_v10  ;;  %v896_v50 = vld [vmem:[#allocation2 + $0x140] sm:$0xff]  ;;  %v969_v10 = vld [vmem:[#allocation2 + $0x388] sm:$0xff] }
 0x1e2   :  { %1116 = vmatpush1.msra.mxu0 %v942_v11  ;;  %1067 = vmatpush1.msra.mxu1 %v856_v0  ;;  %v895_v11 = vld [vmem:[#allocation2 + $0x138] sm:$0xff]  ;;  %v968_v0 = vld [vmem:[#allocation2 + $0x380] sm:$0xff] }
 0x1e3   :  { %1117 = vmatprep.subr.mxu0 %v941_v13  ;;  %1068 = vmatprep.subr.mxu1 %v919_v14  ;;  %v894_v13 = vld [vmem:[#allocation2 + $0x130] sm:$0xff]  ;;  %v967_v14 = vld [vmem:[#allocation2 + $0x378] sm:$0xff] }
 0x1e4   :  { %1118 = vmatpush1.msra.mxu0 %v940_v15  ;;  %1069 = vmatpush2.msra.mxu1 %v918_v16  ;;  %v893_v15 = vld [vmem:[#allocation2 + $0x128] sm:$0xff]  ;;  %v966_v16 = vld [vmem:[#allocation2 + $0x370] sm:$0xff] }
 0x1e5   :  { %1119 = vmatprep.subr.mxu0 %v939_v19  ;;  %1070 = vmatprep.subr.mxu1 %v917_v17  ;;  %v892_v19 = vld [vmem:[#allocation2 + $0x120] sm:$0xff]  ;;  %v965_v17 = vld [vmem:[#allocation2 + $0x368] sm:$0xff] }
 0x1e6   :  { %1120 = vmatpush1.msra.mxu0 %v938_v20  ;;  %1071 = vmatpush2.msra.mxu1 %v916_v21  ;;  %v891_v20 = vld [vmem:[#allocation2 + $0x118] sm:$0xff]  ;;  %v890_v21 = vld [vmem:[#allocation2 + $0x110] sm:$0xff] }
 0x1e7   :  { %1121 = vmatprep.subr.mxu0 %v937_v23  ;;  %1072 = vmatprep.subr.mxu1 %v915_v24  ;;  %v964_v23 = vld [vmem:[#allocation2 + $0x360] sm:$0xff]  ;;  %v889_v24 = vld [vmem:[#allocation2 + $0x108] sm:$0xff] }
 0x1e8   :  { %1122 = vmatpush1.msra.mxu0 %v936_v18  ;;  %1073 = vmatpush2.msra.mxu1 %v914_v26  ;;  %v963_v18 = vld [vmem:[#allocation2 + $0x358] sm:$0xff]  ;;  %v888_v26 = vld [vmem:[#allocation2 + $0x100] sm:$0xff] }
 0x1e9   :  { %1123 = vmatprep.subr.mxu0 %v935_v28  ;;  %1074 = vmatprep.subr.mxu1 %v913_v29  ;;  %v962_v28 = vld [vmem:[#allocation2 + $0x350] sm:$0xff]  ;;  %v1015_v29 = vld [vmem:[#allocation2 + $0x4f8] sm:$0xff] }
 0x1ea   :  { %1124 = vmatpush1.msra.mxu0 %v934_v30  ;;  %1075 = vmatpush2.msra.mxu1 %v912_v31  ;;  %v961_v30 = vld [vmem:[#allocation2 + $0x348] sm:$0xff]  ;;  %v960_v31 = vld [vmem:[#allocation2 + $0x340] sm:$0xff] }
 0x1eb   :  { %1125 = vmatprep.subr.mxu0 %v933_v32  ;;  %1076 = vmatprep.subr.mxu1 %v911_v33  ;;  %v959_v32 = vld [vmem:[#allocation2 + $0x338] sm:$0xff]  ;;  %v958_v33 = vld [vmem:[#allocation2 + $0x330] sm:$0xff] }
 0x1ec   :  { %1126 = vmatpush1.msra.mxu0 %v932_v34  ;;  %1077 = vmatpush2.msra.mxu1 %v910_v35  ;;  %v957_v34 = vld [vmem:[#allocation2 + $0x328] sm:$0xff]  ;;  %v956_v35 = vld [vmem:[#allocation2 + $0x320] sm:$0xff] }
 0x1ed   :  { %1127 = vmatprep.subr.mxu0 %v931_v37  ;;  %1078 = vmatprep.subr.mxu1 %v909_v62  ;;  %v955_v37 = vld [vmem:[#allocation2 + $0x318] sm:$0xff]  ;;  %v954_v62 = vld [vmem:[#allocation2 + $0x310] sm:$0xff] }
 0x1ee   :  { %1128 = vmatpush1.msra.mxu0 %v930_v38  ;;  %1079 = vmatpush2.msra.mxu1 %v908_v2  ;;  %v953_v38 = vld [vmem:[#allocation2 + $0x308] sm:$0xff]  ;;  %v952_v2 = vld [vmem:[#allocation2 + $0x300] sm:$0xff] }
 0x1ef   :  { %1129 = vmatprep.subr.mxu0 %v929_v39  ;;  %1080 = vmatprep.subr.mxu1 %v907_v12  ;;  %v756_v39 = vlaneseq }
 0x1f0   :  { %1130 = vmatpush1.msra.mxu0 %v928_v27  ;;  %1081 = vmatpush2.msra.mxu1 %v906_v40 }
 0x1f1   :  { %1131 = vmatprep.subr.mxu0 %v927_v41  ;;  %1082 = vmatprep.subr.mxu1 %v905_v42  ;;  %v2472_v12 = vshrl.u32 %v756_v39, 7  ;;  %v2481_v41 = vld [vmem:[%s2743_s3] ss:$2 sm:$0x3f] }
 0x1f2   :  { %1132 = vmatpush1.msra.mxu0 %v926_v43  ;;  %1083 = vmatpush2.msra.mxu1 %v904_v44 }
 0x1f3   :  { %1133 = vmatprep.subr.mxu0 %v925_v45  ;;  %1084 = vmatprep.subr.mxu1 %v903_v47  ;;  %v2475_v27 = vsub.s32 0, %v2472_v12  ;;  %v766_v40 = vsub.s32 2, %v2472_v12  ;;  %v2484_v42 = vsub.s32 1, %v2472_v12  ;;  %v770_v43 = vsub.s32 3, %v2472_v12 }
 0x1f4   :  { %1134 = vmatpush1.msra.mxu0 %v924_v9  ;;  %1085 = vmatpush2.msra.mxu1 %v902_v36  ;;  %v2492_v45 = vld [vmem:[%s2743_s3 + $0x1] ss:$2 sm:$0x3f] }
 0x1f5   :  { %1135 = vmatprep.subr.mxu0 %v923_v48  ;;  %1086 = vmatprep.subr.mxu1 %v901_v49  ;;  %v759_v44 = vrot.slane %v2481_v41, %v2475_v27  ;;  %v767_v47 = vrot.slane %v2481_v41, %v766_v40  ;;  %v763_v9 = vrot.slane %v2481_v41, %v2484_v42 }
 0x1f6   :  { %1136 = vmatpush1.msra.mxu0 %v922_v51  ;;  %1087 = vmatpush2.msra.mxu1 %v900_v53  ;;  %v771_v36 = vrot.slane %v2481_v41, %v770_v43  ;;  %v798_v49 = vrot.slane %v2492_v45, %v2475_v27  ;;  %v806_v53 = vrot.slane %v2492_v45, %v766_v40 }
 0x1f7   :  { %1137 = vmatprep.subr.mxu0 %v921_v54  ;;  %1088 = vmatprep.subr.mxu1 %v899_v55 }
 0x1f8   :  { %1138 = vmatpush1.msra.mxu0 %v920_v56  ;;  %1089 = vmatpush2.msra.mxu1 %v898_v52  ;;  %v802_v56 = vrot.slane %v2492_v45, %v2484_v42  ;;  %v810_v52 = vrot.slane %v2492_v45, %v770_v43  ;;  %v991_v43 = vld [vmem:[#allocation2 + $0x438] sm:$0xff] }
 0x1f9   :  { %1139 = vmatprep.subr.mxu0 %v983_v58  ;;  %1090 = vmatprep.subr.mxu1 %v897_v59 }
 0x1fa   :  { %1140 = vmatpush2.msra.mxu0 %v982_v57  ;;  %1091 = vmatpush2.msra.mxu1 %v896_v50  ;;  %v1011_v50 = vld [vmem:[#allocation2 + $0x4d8] sm:$0xff] }
 0x1fb   :  { %1141 = vmatprep.subr.mxu0 %v981_v60  ;;  %1092 = vmatprep.subr.mxu1 %v895_v11  ;;  %v1009_v11 = vld [vmem:[#allocation2 + $0x4c8] sm:$0xff] }
 0x1fc   :  { %1142 = vmatpush2.msra.mxu0 %v980_v61  ;;  %1093 = vmatpush2.msra.mxu1 %v894_v13  ;;  %v1007_v13 = vld [vmem:[#allocation2 + $0x4b8] sm:$0xff] }
 0x1fd   :  { %1143 = vmatprep.subr.mxu0 %v979_v63  ;;  %1094 = vmatprep.subr.mxu1 %v893_v15  ;;  %v1005_v15 = vld [vmem:[#allocation2 + $0x4a8] sm:$0xff] }
 0x1fe   :  { %1144 = vmatpush2.msra.mxu0 %v978_v1  ;;  %1095 = vmatpush2.msra.mxu1 %v892_v19  ;;  %v1003_v19 = vld [vmem:[#allocation2 + $0x498] sm:$0xff] }
 0x1ff   :  { %1145 = vmatprep.subr.mxu0 %v977_v46  ;;  %1096 = vmatprep.subr.mxu1 %v891_v20  ;;  %v1002_v20 = vld [vmem:[#allocation2 + $0x490] sm:$0xff] }
 0x200   :  { %1146 = vmatpush2.msra.mxu0 %v976_v3  ;;  %1097 = vmatpush2.msra.mxu1 %v890_v21  ;;  %v1001_v21 = vld [vmem:[#allocation2 + $0x488] sm:$0xff] }
 0x201   :  { %1147 = vmatprep.subr.mxu0 %v975_v4  ;;  %1098 = vmatprep.subr.mxu1 %v889_v24  ;;  %v832_v24 = vand.u32 127, %v756_v39  ;;  %v992_v39 = vld [vmem:[#allocation2 + $0x440] sm:$0xff] }
 0x202   :  { %1148 = vmatpush2.msra.mxu0 %v974_v5  ;;  %1099 = vmatpush2.msra.mxu1 %v888_v26  ;;  %v999_v26 = vld [vmem:[#allocation2 + $0x478] sm:$0xff] }
 0x203   :  { %1149 = vmatprep.subr.mxu0 %v973_v6  ;;  %1178 = vmatprep.subr.mxu1 %v1015_v29  ;;  %v998_v29 = vld [vmem:[#allocation2 + $0x470] sm:$0xff] }
 0x204   :  { %1150 = vmatpush2.msra.mxu0 %v972_v7  ;;  %v1014_v7 = vld [vmem:[#allocation2 + $0x4f0] sm:$0xff] }
 0x205   :  { %1151 = vmatprep.subr.mxu0 %v971_v8  ;;  %v1013_v8 = vld [vmem:[#allocation2 + $0x4e8] sm:$0xff] }
 0x206   :  { %1152 = vmatpush2.msra.mxu0 %v970_v22  ;;  %v1012_v22 = vld [vmem:[#allocation2 + $0x4e0] sm:$0xff] }
 0x207   :  { %1153 = vmatprep.subr.mxu0 %v969_v10  ;;  %v1010_v10 = vld [vmem:[#allocation2 + $0x4d0] sm:$0xff] }
 0x208   :  { %1154 = vmatpush2.msra.mxu0 %v968_v0  ;;  %v1008_v0 = vld [vmem:[#allocation2 + $0x4c0] sm:$0xff] }
 0x209   :  { %1155 = vmatprep.subr.mxu0 %v967_v14  ;;  %v1006_v14 = vld [vmem:[#allocation2 + $0x4b0] sm:$0xff] }
 0x20a   :  { %1156 = vmatpush2.msra.mxu0 %v966_v16  ;;  %v1004_v16 = vld [vmem:[#allocation2 + $0x4a0] sm:$0xff] }
 0x20b   :  { %1157 = vmatprep.subr.mxu0 %v965_v17  ;;  %v778_v17 = vsub.s32 5, %v2472_v12 }
 0x20c   :  { %1158 = vmatpush2.msra.mxu0 %v964_v23  ;;  %v1000_v23 = vld [vmem:[#allocation2 + $0x480] sm:$0xff] }
 0x20d   :  { %1159 = vmatprep.subr.mxu0 %v963_v18  ;;  %v779_v18 = vrot.slane %v2481_v41, %v778_v17 }
 0x20e   :  { %1160 = vmatpush2.msra.mxu0 %v962_v28 }
 0x20f   :  { %1161 = vmatprep.subr.mxu0 %v961_v30  ;;  %v818_v30 = vrot.slane %v2492_v45, %v778_v17 }
 0x210   :  { %1162 = vmatpush2.msra.mxu0 %v960_v31  ;;  %v997_v31 = vld [vmem:[#allocation2 + $0x468] sm:$0xff] }
 0x211   :  { %1163 = vmatprep.subr.mxu0 %v959_v32 }
 0x212   :  { %1164 = vmatpush2.msra.mxu0 %v958_v33  ;;  %v996_v33 = vld [vmem:[#allocation2 + $0x460] sm:$0xff] }
 0x213   :  { %1165 = vmatprep.subr.mxu0 %v957_v34  ;;  %v837_v34 = vadd.s32 640, %v832_v24 }
 0x214   :  { %1166 = vmatpush2.msra.mxu0 %v956_v35 }
 0x215   :  { %1167 = vmatprep.subr.mxu0 %v955_v37  ;;  %v995_v37 = vld [vmem:[#allocation2 + $0x458] sm:$0xff]  ;;  %vm843_vm11 = vcmp.lt.s32.totalorder %v837_v34, 672 }
 0x216   :  { %1168 = vmatpush2.msra.mxu0 %v954_v62  ;;  %v994_v62 = vld [vmem:[#allocation2 + $0x450] sm:$0xff] }
 0x217   :  { %1169 = vmatprep.subr.mxu0 %v953_v38 }
 0x218   :  { %1170 = vmatpush2.msra.mxu0 %v952_v2  ;;  %v993_v2 = vld [vmem:[#allocation2 + $0x448] sm:$0xff] }
 0x281   :  { %v607_v48 = vpop.f32.mrf.mxu0  ;;  %v678_v51 = vpop.f32.mrf.mxu1 }
 0x282   :  { %v786_v54 = vmul.f32 %v759_v44, %v607_v48  ;;  %v788_v55 = vmul.f32 %v767_v47, %v678_v51  ;;  %v990_v44 = vld [vmem:[#allocation2 + $0x430] sm:$0xff]  ;;  %v988_v48 = vld [vmem:[#allocation2 + $0x420] sm:$0xff] }
 0x283   :  { %v609_v58 = vpop.f32.mrf.mxu0  ;;  %v680_v59 = vpop.f32.mrf.mxu1  ;;  %v986_v51 = vld [vmem:[#allocation2 + $0x410] sm:$0xff] }
 0x284   :  { %v787_v57 = vmul.f32 %v763_v9, %v609_v58  ;;  %v789_v60 = vmul.f32 %v771_v36, %v680_v59  ;;  %v825_v61 = vadd.f32 %v798_v49, %v786_v54  ;;  %v827_v63 = vadd.f32 %v806_v53, %v788_v55  ;;  %v989_v9 = vld [vmem:[#allocation2 + $0x428] sm:$0xff]  ;;  %v987_v49 = vld [vmem:[#allocation2 + $0x418] sm:$0xff]  ;;  %v984_v55 = vld [vmem:[#allocation2 + $0x400] sm:$0xff] }
 0x285   :  { %v774_v36 = vsub.s32 4, %v2472_v12  ;;  %v985_v53 = vld [vmem:[#allocation2 + $0x408] sm:$0xff]  ;;  %v1023_v58 = vld [vmem:[#allocation2 + $0x538] sm:$0xff] }
 0x286   :  { %v826_v1 = vadd.f32 %v802_v56, %v787_v57  ;;  %v828_v46 = vadd.f32 %v810_v52, %v789_v60  ;;  %v844_v5 = vmax.f32 %v825_v61, 0.0  ;;  %v846_v6 = vmax.f32 %v827_v63, 0.0  ;;  %v1025_v56 = vld [vmem:[#allocation2 + $0x548] sm:$0x3f]  ;;  %v1024_v52 = vld [vmem:[#allocation2 + $0x540] sm:$0x3f] }
 0x287   :  { %v775_v54 = vrot.slane %v2481_v41, %v774_v36  ;;  %v814_v59 = vrot.slane %v2492_v45, %v774_v36  ;;  %v1022_v57 = vld [vmem:[#allocation2 + $0x530] sm:$0xff]  ;;  %v1021_v60 = vld [vmem:[#allocation2 + $0x528] sm:$0xff]  ;;  %v1020_v61 = vld [vmem:[#allocation2 + $0x520] sm:$0xff] }
 0x288   :  { %v845_v3 = vmax.f32 %v826_v1, 0.0  ;;  %v847_v4 = vmax.f32 %v828_v46, 0.0  ;;  %v1019_v41 = vld [vmem:[#allocation2 + $0x518] sm:$0xff]  ;;  %v1018_v1 = vld [vmem:[#allocation2 + $0x510] sm:$0xff]  ;;  %v1017_v46 = vld [vmem:[#allocation2 + $0x508] sm:$0xff] }
 0x28a   :  { %1100 = vmatprep.mubr.f32.mxu1 %v845_v3  ;;  %1171 = vmatprep.mubr.f32.mxu0 %v847_v4  ;;  %v1016_v3 = vld [vmem:[#allocation2 + $0x500] sm:$0xff] }
 0x28b   :  { %1101 = vmatmul.mubr.f32.vlgmr.msra.gmra.mxu1 %v844_v5  ;;  %1172 = vmatmul.mubr.f32.vlgmr.msra.gmra.mxu0 %v846_v6  ;;  %v1249_v6 = vld [vmem:[%s2745_s5] ss:$4 sm:$0x3] }
 0x28c   :  { %1179 = vmatpush1.msra.mxu1 %v1014_v7 }
 0x28d   :  { %1180 = vmatprep.subr.mxu1 %v1013_v8 }
 0x28e   :  { %1181 = vmatpush1.msra.mxu1 %v1012_v22  ;;  %v1697_v22 = vld [vmem:[%s2745_s5 + $0x1] ss:$4 sm:$0x3] }
 0x28f   :  { %1182 = vmatprep.subr.mxu1 %v1011_v50 }
 0x290   :  { %1183 = vmatpush1.msra.mxu1 %v1010_v10  ;;  %v1254_v10 = vrot.slane %v1249_v6, %v2475_v27 }
 0x291   :  { %1184 = vmatprep.subr.mxu1 %v1009_v11 }
 0x292   :  { %1185 = vmatpush1.msra.mxu1 %v1008_v0 }
 0x293   :  { %1186 = vmatprep.subr.mxu1 %v1007_v13 }
 0x294   :  { %1187 = vmatpush1.msra.mxu1 %v1006_v14  ;;  %v1269_v14 = vrot.slane %v1697_v22, %v2475_v27 }
 0x295   :  { %1188 = vmatprep.subr.mxu1 %v1005_v15  ;;  %v1258_v15 = vrot.slane %v1249_v6, %v2484_v42 }
 0x296   :  { %1189 = vmatpush1.msra.mxu1 %v1004_v16 }
 0x297   :  { %1190 = vmatprep.subr.mxu1 %v1003_v19 }
 0x298   :  { %1191 = vmatpush1.msra.mxu1 %v1002_v20  ;;  %v1273_v20 = vrot.slane %v1697_v22, %v2484_v42  ;;  %v1419_v22 = vld [vmem:[%s2746_s6 + $0x68] sm:$0xff] }
 0x299   :  { %v749_v28 = vpop.f32.mrf.mxu0  ;;  %1192 = vmatprep.subr.mxu1 %v1001_v21 }
 0x29a   :  { %1193 = vmatpush1.msra.mxu1 %v1000_v23  ;;  %v790_v12 = vmul.f32 %v775_v54, %v749_v28 }
 0x29b   :  { %v751_v32 = vpop.f32.mrf.mxu0  ;;  %1194 = vmatprep.subr.mxu1 %v999_v26 }
 0x29c   :  { %v791_v35 = vmul.f32 %v779_v18, %v751_v32  ;;  %1195 = vmatpush1.msra.mxu1 %v998_v29  ;;  %v829_v63 = vadd.f32 %v814_v59, %v790_v12 }
 0x29d   :  { %1196 = vmatprep.subr.mxu1 %v997_v31 }
 0x29e   :  { %v830_v38 = vadd.f32 %v818_v30, %v791_v35  ;;  %1197 = vmatpush1.msra.mxu1 %v996_v33  ;;  %v848_v4 = vmax.f32 %v829_v63, 0.0  ;;  %v1436_v63 = vld [vmem:[%s2746_s6 + $0xf0] sm:$0xff] }
 0x29f   :  { %1198 = vmatprep.subr.mxu1 %v995_v37 }
 0x2a0   :  { %v849_v40 = vmax.f32 %v830_v38, 0.0  ;;  %1199 = vmatpush1.msra.mxu1 %v994_v62 }
 0x2a1   :  { %1200 = vmatprep.subr.mxu1 %v993_v2 }
 0x2a2   :  { %1201 = vmatpush1.msra.mxu1 %v992_v39  ;;  %v855_v47 = vsel %vm843_vm11, %v849_v40, %v830_v38 }
 0x2a3   :  { %1202 = vmatprep.subr.mxu1 %v991_v43  ;;  %1696 = vmatprep.mubr.msk.f32.mxu1 %vm1026_vm12, %v855_v47 }
 0x2a4   :  { %1203 = vmatpush1.msra.mxu1 %v990_v44 }
 0x2a5   :  { %1204 = vmatprep.subr.mxu1 %v989_v9 }
 0x2a6   :  { %1205 = vmatpush1.msra.mxu1 %v988_v48 }
 0x2a7   :  { %1206 = vmatprep.subr.mxu1 %v987_v49 }
 0x2a8   :  { %1207 = vmatpush1.msra.mxu1 %v986_v51 }
 0x2a9   :  { %1208 = vmatprep.subr.mxu1 %v985_v53 }
 0x2aa   :  { %1209 = vmatpush1.msra.mxu1 %v984_v55 }
 0x2ab   :  { %1694 = vmatprep.subr.msk.mxu1 %vm445_vm9, %v1025_v56 }
 0x2ac   :  { %1695 = vmatpush2.msk.msra.mxu1 %vm445_vm9, %v1024_v52 }
 0x2ad   :  { %1234 = vmatprep.subr.mxu1 %v1023_v58 }
 0x2ae   :  { %1235 = vmatpush2.msra.mxu1 %v1022_v57 }
 0x2af   :  { %1236 = vmatprep.subr.mxu1 %v1021_v60  ;;  %v1892_v60 = vmov 0  }
 0x2b0   :  { %1237 = vmatpush2.msra.mxu1 %v1020_v61  ;;  %1808 = vset.pattern.permute.xlu0 %v1892_v60  ;;  %v1437_v61 = vld [vmem:[%s2746_s6 + $0xf8] sm:$0xff] }
 0x2b1   :  { %1238 = vmatprep.subr.mxu1 %v1019_v41  ;;  %1809 = vset.pattern.permute.xlu1 %v1892_v60  ;;  %v1421_v41 = vld [vmem:[%s2746_s6 + $0x78] sm:$0xff] }
 0x2b2   :  { %1239 = vmatpush2.msra.mxu1 %v1018_v1  ;;  %1703 = vmatprep.subr.mxu0 %v1437_v61  ;;  %v1420_v1 = vld [vmem:[%s2746_s6 + $0x70] sm:$0xff] }
 0x2b3   :  { %1240 = vmatprep.subr.mxu1 %v1017_v46  ;;  %1704 = vmatpush3.msra.mxu0 %v1421_v41  ;;  %v1435_v46 = vld [vmem:[%s2746_s6 + $0xe8] sm:$0xff] }
 0x2b4   :  { %1241 = vmatpush2.msra.mxu1 %v1016_v3  ;;  %1705 = vmatprep.subr.mxu0 %v1436_v63 }
 0x2b5   :  { %1243 = vmatmul.mubr.f32.vlgmr.msra.gmra.mxu1 %v848_v4  ;;  %1755 = vmatprep.subr.mxu1 %v1891_v25 }
 0x2b6   :  { %1706 = vmatpush3.msra.mxu0 %v1420_v1  ;;  %1787 = vmatprep.mubr.msk.f32.mxu1 %vm1894_vm13, %v1891_v25 }
 0x2b7   :  { %1707 = vmatprep.subr.mxu0 %v1435_v46 }
 0x2b8   :  { %1708 = vmatpush3.msra.mxu0 %v1419_v22  ;;  %v1557_v22 = vld [vmem:[%s2748_s8 + $0x58] sm:$0xff] }
 0x34b   :  { %v1102_v45 = vpop.f32.mrf.mxu1  ;;  %v1173_v5 = vpop.f32.mrf.mxu0 }
 0x34c   :  { %v1174_v50 = vadd.f32 %v1173_v5, %v1102_v45 }
 0x34d   :  { %v1104_v7 = vpop.f32.mrf.mxu1  ;;  %v1175_v8 = vpop.f32.mrf.mxu0 }
 0x34e   :  { %v1176_v0 = vadd.f32 %v1175_v8, %v1104_v7 }
 0x375   :  { %v1244_v11 = vpop.f32.mrf.mxu1 }
 0x376   :  { %v1245_v13 = vadd.f32 %v1244_v11, %v1174_v50  ;;  %v1434_v50 = vld [vmem:[%s2746_s6 + $0xe0] sm:$0xff] }
 0x377   :  { %v1246_v16 = vpop.f32.mrf.mxu1  ;;  %1709 = vmatprep.subr.mxu0 %v1434_v50 }
 0x378   :  { %v1261_v19 = vmul.f32 %v1254_v10, %v1245_v13  ;;  %v1247_v17 = vadd.f32 %v1246_v16, %v1176_v0  ;;  %v1418_v10 = vld [vmem:[%s2746_s6 + $0x60] sm:$0xff]  ;;  %v1433_v13 = vld [vmem:[%s2746_s6 + $0xd8] sm:$0xff] }
 0x379   :  { %v1417_v16 = vld [vmem:[%s2746_s6 + $0x58] sm:$0xff]  ;;  %1710 = vmatpush3.msra.mxu0 %v1418_v10  ;;  %v1556_v10 = vld [vmem:[%s2748_s8 + $0x50] sm:$0xff] }
 0x37a   :  { %v1276_v21 = vadd.f32 %v1269_v14, %v1261_v19  ;;  %v1262_v23 = vmul.f32 %v1258_v15, %v1247_v17  ;;  %v1432_v17 = vld [vmem:[%s2746_s6 + $0xd0] sm:$0xff]  ;;  %1711 = vmatprep.subr.mxu0 %v1433_v13 }
 0x37b   :  { %1712 = vmatpush3.msra.mxu0 %v1417_v16 }
 0x37c   :  { %v2524_v24 = vmax.f32 %v1276_v21, 0.0  ;;  %v2526_v18 = vadd.f32 %v1273_v20, %v1262_v23  ;;  %v1416_v21 = vld [vmem:[%s2746_s6 + $0x50] sm:$0xff]  ;;  %v1431_v23 = vld [vmem:[%s2746_s6 + $0xc8] sm:$0xff]  ;;  %1713 = vmatprep.subr.mxu0 %v1432_v17 }
 0x37d   :  { %1714 = vmatpush3.msra.mxu0 %v1416_v21 }
 0x37e   :  { %v1288_v26 = vrot.slane %v2524_v24, 2  ;;  %v1289_v28 = vrot.slane %v2526_v18, 2  ;;  %v1284_v29 = vmul.f32 %v2524_v24, %v2524_v24  ;;  %v1285_v30 = vmul.f32 %v2526_v18, %v2526_v18  ;;  %1715 = vmatprep.subr.mxu0 %v1431_v23  ;;  %v1552_v23 = vld [vmem:[%s2748_s8 + $0x30] sm:$0xff] }
 0x37f   :  { %v1294_v33 = vrot.slane %v2524_v24, 4  ;;  %v1295_v34 = vrot.slane %v2526_v18, 4  ;;  %v1300_v2 = vrot.slane %v2524_v24, 6  ;;  %v1301_v39 = vrot.slane %v2526_v18, 6 }
 0x380   :  { %v1292_v31 = vadd.f32 %v1288_v26, %v2524_v24  ;;  %v1293_v32 = vadd.f32 %v1289_v28, %v2526_v18  ;;  %v1308_v35 = vrot.slane %v1284_v29, 2  ;;  %v1309_v37 = vrot.slane %v1285_v30, 2  ;;  %v1415_v26 = vld [vmem:[%s2746_s6 + $0x48] sm:$0xff]  ;;  %v1430_v28 = vld [vmem:[%s2746_s6 + $0xc0] sm:$0xff] }
 0x381   :  { %v1314_v44 = vrot.slane %v1284_v29, 4  ;;  %v1315_v47 = vrot.slane %v1285_v30, 4  ;;  %v1320_v51 = vrot.slane %v1284_v29, 6  ;;  %v1321_v53 = vrot.slane %v1285_v30, 6  ;;  %1716 = vmatpush3.msra.mxu0 %v1415_v26  ;;  %v1551_v26 = vld [vmem:[%s2748_s8 + $0x28] sm:$0xff] }
 0x382   :  { %v1298_v62 = vadd.f32 %v1294_v33, %v1292_v31  ;;  %v1299_v38 = vadd.f32 %v1295_v34, %v1293_v32  ;;  %v1312_v40 = vadd.f32 %v1308_v35, %v1284_v29  ;;  %v1313_v43 = vadd.f32 %v1309_v37, %v1285_v30  ;;  %v1414_v29 = vld [vmem:[%s2746_s6 + $0x40] sm:$0xff]  ;;  %v1429_v30 = vld [vmem:[%s2746_s6 + $0xb8] sm:$0xff]  ;;  %1717 = vmatprep.subr.mxu0 %v1430_v28  ;;  %v1428_v32 = vld [vmem:[%s2746_s6 + $0xb0] sm:$0xff] }
 0x383   :  { %v1413_v31 = vld [vmem:[%s2746_s6 + $0x38] sm:$0xff]  ;;  %1718 = vmatpush3.msra.mxu0 %v1414_v29  ;;  %v1412_v33 = vld [vmem:[%s2746_s6 + $0x30] sm:$0xff]  ;;  %v1427_v34 = vld [vmem:[%s2746_s6 + $0xa8] sm:$0xff] }
 0x384   :  { %v1304_v9 = vadd.f32 %v1300_v2, %v1298_v62  ;;  %v1305_v36 = vadd.f32 %v1301_v39, %v1299_v38  ;;  %v1318_v48 = vadd.f32 %v1314_v44, %v1312_v40  ;;  %v1319_v49 = vadd.f32 %v1315_v47, %v1313_v43  ;;  %1719 = vmatprep.subr.mxu0 %v1429_v30  ;;  %v1411_v35 = vld [vmem:[%s2746_s6 + $0x28] sm:$0xff]  ;;  %v1426_v37 = vld [vmem:[%s2746_s6 + $0xa0] sm:$0xff]  ;;  %v1425_v38 = vld [vmem:[%s2746_s6 + $0x98] sm:$0xff] }
 0x385   :  { %1720 = vmatpush3.msra.mxu0 %v1413_v31  ;;  %v1410_v62 = vld [vmem:[%s2746_s6 + $0x20] sm:$0xff]  ;;  %v1409_v43 = vld [vmem:[%s2746_s6 + $0x18] sm:$0xff]  ;;  %v1548_v30 = vld [vmem:[%s2748_s8 + $0x10] sm:$0xff] }
 0x386   :  { %v1326_v54 = vsel %vm441_vm15, %v1304_v9, 0.0  ;;  %v1327_v55 = vsel %vm441_vm15, %v1305_v36, 0.0  ;;  %v1324_v52 = vadd.f32 %v1320_v51, %v1318_v48  ;;  %v1325_v58 = vadd.f32 %v1321_v53, %v1319_v49  ;;  %1721 = vmatprep.subr.mxu0 %v1428_v32  ;;  %v1424_v9 = vld [vmem:[%s2746_s6 + $0x90] sm:$0xff]  ;;  %v1423_v51 = vld [vmem:[%s2746_s6 + $0x88] sm:$0xff]  ;;  %v1550_v28 = vld [vmem:[%s2748_s8 + $0x20] sm:$0xff] }
 0x387   :  { %v1328_v56 = vadd.f32 %v1327_v55, %v1326_v54  ;;  %1722 = vmatpush3.msra.mxu0 %v1412_v33  ;;  %v1408_v48 = vld [vmem:[%s2746_s6 + $0x10] sm:$0xff]  ;;  %v1407_v53 = vld [vmem:[%s2746_s6 + $0x8] sm:$0xff]  ;;  %v1422_v54 = vld [vmem:[%s2746_s6 + $0x80] sm:$0xff] }
 0x388   :  { %v1332_v12 = vsel %vm441_vm15, %v1324_v52, 0.0  ;;  %v1333_v59 = vsel %vm441_vm15, %v1325_v58, 0.0  ;;  %1723 = vmatprep.subr.mxu0 %v1427_v34  ;;  %v1406_v55 = vld [vmem:[%s2746_s6] sm:$0xff]  ;;  %v1549_v29 = vld [vmem:[%s2748_s8 + $0x18] sm:$0xff]  ;;  %v1547_v31 = vld [vmem:[%s2748_s8 + $0x8] sm:$0xff] }
 0x389   :  { %1329 = vadd.xlane.f32.xlu0 %v1328_v56  ;;  %v1334_v57 = vadd.f32 %v1333_v59, %v1332_v12  ;;  %1724 = vmatpush3.msra.mxu0 %v1411_v35  ;;  %v1698_v52 = vld [vmem:[%s2745_s5 + $0x2] ss:$4 sm:$0x3]  ;;  %v1699_v58 = vld [vmem:[%s2745_s5 + $0x3] ss:$4 sm:$0x3] }
 0x38a   :  { %1725 = vmatprep.subr.mxu0 %v1426_v37  ;;  %v1386_v60 = vrot.slane %v1698_v52, %v2484_v42  ;;  %v1397_v41 = vrot.slane %v1699_v58, %v2475_v27  ;;  %v1401_v46 = vrot.slane %v1699_v58, %v2484_v42  ;;  %v1546_v32 = vld [vmem:[%s2748_s8] sm:$0xff] }
 0x38b   :  { %1335 = vadd.xlane.f32.xlu1 %v1334_v57  ;;  %1726 = vmatpush3.msra.mxu0 %v1410_v62  ;;  %v1382_v57 = vrot.slane %v1698_v52, %v2475_v27  ;;  %v1559_v27 = vld [vmem:[%s2748_s8 + $0x68] sm:$0xff]  ;;  %v1700_v34 = vld [vmem:[%s2747_s7] ss:$0 sm:$0xff]  ;;  %v1701_v62 = vld [vmem:[%s2747_s7 + $0x1] ss:$0 sm:$0xff] }
 0x38c   :  { %1727 = vmatprep.subr.mxu0 %v1425_v38 }
 0x38d   :  { %1728 = vmatpush3.msra.mxu0 %v1409_v43 }
 0x38e   :  { %1729 = vmatprep.subr.mxu0 %v1424_v9 }
 0x38f   :  { %1730 = vmatpush3.msra.mxu0 %v1408_v48 }
 0x390   :  { %1731 = vmatprep.subr.mxu0 %v1423_v51 }
 0x391   :  { %1732 = vmatpush3.msra.mxu0 %v1407_v53 }
 0x392   :  { %1733 = vmatprep.subr.mxu0 %v1422_v54 }
 0x393   :  { %1734 = vmatpush3.msra.mxu0 %v1406_v55 }
 0x412   :  { %v1330_v3 = vpop.xlane.xlu0 %1329 }
 0x413   :  { %v1331_v4 = vmul.f32 0.0010869565, %v1330_v3 }
 0x414   :  { %v1336_v5 = vpop.xlane.xlu1 %1335 }
 0x415   :  { %v1338_v45 = vmul.f32 %v1331_v4, %v1331_v4  ;;  %v1343_v6 = vrot.slane %v1331_v4, 6  ;;  %v1345_v7 = vrot.slane %v1331_v4, 4  ;;  %v1337_v8 = vmul.f32 0.0010869565, %v1336_v5 }
 0x416   :  { %v1347_v11 = vrot.slane %v1331_v4, 2 }
 0x417   :  { %v1349_v0 = vsel %vm441_vm15, %v1331_v4, %v1343_v6  ;;  %v1339_v14 = vsub.f32 %v1337_v8, %v1338_v45 }
 0x418   :  { %v1350_v15 = vsel %vm443_vm7, %v1349_v0, %v1345_v7  ;;  %v1558_v7 = vld [vmem:[%s2748_s8 + $0x60] sm:$0xff] }
 0x419   :  { %v1351_v19 = vsel %vm445_vm9, %v1350_v15, %v1347_v11  ;;  %v1340_v20 = vadd.f32 1e-05, %v1339_v14  ;;  %v1555_v14 = vld [vmem:[%s2748_s8 + $0x48] sm:$0xff] }
 0x41a   :  { %1364 = vperm.xlu0 %1808, %v1351_v19   ;;  %v1554_v19 = vld [vmem:[%s2748_s8 + $0x40] sm:$0xff] }
 0x41b   :  { %1826 = vrsqrt.f32 %v1340_v20  ;;  %v1553_v20 = vld [vmem:[%s2748_s8 + $0x38] sm:$0xff] }
 0x428   :  { %v1827_v2 = vpop.eup %1826 }
 0x429   :  { %v1353_v39 = vrot.slane %v1827_v2, 6  ;;  %v1355_v40 = vrot.slane %v1827_v2, 4  ;;  %v1357_v44 = vrot.slane %v1827_v2, 2 }
 0x42b   :  { %v1359_v47 = vsel %vm441_vm15, %v1827_v2, %v1353_v39  ;;  %vm1639_vm15 = vcmask 517120  }
 0x42c   :  { %v1360_v36 = vsel %vm443_vm7, %v1359_v47, %v1355_v40  ;;  %v1702_v47 = vld [vmem:[%s2749_s9] ss:$0 sm:$0xff]  ;;  %s1895_s9 = smov [#allocation5]  }
 0x42d   :  { %v1361_v49 = vsel %vm445_vm9, %v1360_v36, %v1357_v44 }
 0x42e   :  { %1371 = vperm.xlu1 %1809, %v1361_v49  }
 0x495   :  { %v1365_v56 = vpop.permute.xlu0 %1364 }
 0x496   :  { %v1367_v12 = vsub.f32 %v2524_v24, %v1365_v56  ;;  %v1368_v59 = vsub.f32 %v2526_v18, %v1365_v56  ;;  %v1561_v24 = vld [vmem:[%s2748_s8 + $0x78] sm:$0xff]  ;;  %v1560_v18 = vld [vmem:[%s2748_s8 + $0x70] sm:$0xff] }
 0x497   :  { %1756 = vmatpush3.msra.mxu1 %v1561_v24 }
 0x498   :  { %1757 = vmatprep.subr.mxu1 %v1891_v25 }
 0x499   :  { %1758 = vmatpush3.msra.mxu1 %v1560_v18 }
 0x49a   :  { %1759 = vmatprep.subr.mxu1 %v1891_v25 }
 0x49b   :  { %1760 = vmatpush3.msra.mxu1 %v1559_v27 }
 0x49c   :  { %1761 = vmatprep.subr.mxu1 %v1891_v25 }
 0x49d   :  { %1762 = vmatpush3.msra.mxu1 %v1558_v7 }
 0x49e   :  { %1763 = vmatprep.subr.mxu1 %v1891_v25 }
 0x49f   :  { %1764 = vmatpush3.msra.mxu1 %v1557_v22 }
 0x4a0   :  { %1765 = vmatprep.subr.mxu1 %v1891_v25 }
 0x4a1   :  { %1766 = vmatpush3.msra.mxu1 %v1556_v10 }
 0x4a2   :  { %1767 = vmatprep.subr.mxu1 %v1891_v25 }
 0x4a3   :  { %1768 = vmatpush3.msra.mxu1 %v1555_v14 }
 0x4a4   :  { %1769 = vmatprep.subr.mxu1 %v1891_v25 }
 0x4a5   :  { %1770 = vmatpush3.msra.mxu1 %v1554_v19 }
 0x4a6   :  { %1771 = vmatprep.subr.mxu1 %v1891_v25 }
 0x4a7   :  { %1772 = vmatpush3.msra.mxu1 %v1553_v20 }
 0x4a8   :  { %1773 = vmatprep.subr.mxu1 %v1891_v25 }
 0x4a9   :  { %v1372_v61 = vpop.permute.xlu1 %1371  ;;  %1774 = vmatpush3.msra.mxu1 %v1552_v23 }
 0x4aa   :  { %v1374_v63 = vmul.f32 %v1372_v61, %v1367_v12  ;;  %v1375_v1 = vmul.f32 %v1372_v61, %v1368_v59  ;;  %1775 = vmatprep.subr.mxu1 %v1891_v25 }
 0x4ab   :  { %1776 = vmatpush3.msra.mxu1 %v1551_v26 }
 0x4ac   :  { %v1389_v3 = vmul.f32 %v1382_v57, %v1374_v63  ;;  %v1390_v4 = vmul.f32 %v1386_v60, %v1375_v1  ;;  %1777 = vmatprep.subr.mxu1 %v1891_v25 }
 0x4ad   :  { %1778 = vmatpush3.msra.mxu1 %v1550_v28 }
 0x4ae   :  { %v1404_v45 = vadd.f32 %v1397_v41, %v1389_v3  ;;  %v1405_v5 = vadd.f32 %v1401_v46, %v1390_v4  ;;  %1779 = vmatprep.subr.mxu1 %v1891_v25 }
 0x4af   :  { %1780 = vmatpush3.msra.mxu1 %v1549_v29 }
 0x4b0   :  { %1502 = vmatprep.mubr.f32.mxu0 %v1405_v5  ;;  %1781 = vmatprep.subr.mxu1 %v1891_v25 }
 0x4b1   :  { %1503 = vmatmul.mubr.f32.vlgmr.msra.gmra.mxu0 %v1404_v45  ;;  %1782 = vmatpush3.msra.mxu1 %v1548_v30 }
 0x4b2   :  { %1783 = vmatprep.subr.mxu1 %v1891_v25 }
 0x4b3   :  { %1784 = vmatpush3.msra.mxu1 %v1547_v31 }
 0x4b4   :  { %1785 = vmatprep.subr.mxu1 %v1891_v25 }
 0x4b5   :  { %1786 = vmatpush3.msra.mxu1 %v1546_v32 }
 0x571   :  { %v1735_v42 = vpop.f32.mrf.mxu0 }
 0x573   :  { %v1736_v6 = vpop.f32.mrf.mxu0 }
 0x574   :  { %v1737_v8 = vadd.f32 %v1736_v6, %v1735_v42 }
 0x576   :  { %v1509_v50 = vrot.slane %v1737_v8, 2  ;;  %v1517_v0 = vrot.slane %v1737_v8, 4  ;;  %v1520_v16 = vrot.slane %v1737_v8, 6 }
 0x578   :  { %v1516_v11 = vadd.f32 %v1737_v8, %v1509_v50  ;;  %v1511_v13 = vmax.f32 %v1737_v8, %v1509_v50 }
 0x57a   :  { %v1519_v15 = vadd.f32 %v1517_v0, %v1516_v11  ;;  %v1513_v33 = vrot.slane %v1511_v13, 4 }
 0x57c   :  { %v1522_v17 = vadd.f32 %v1520_v16, %v1519_v15  ;;  %v1515_v35 = vmax.f32 %v1511_v13, %v1513_v33 }
 0x57e   :  { %v1523_v21 = vmul.f32 0.25, %v1522_v17 }
 0x580   :  { %1525 = vrot.lane.b32.xlu1 %v1523_v21, %s1893_s21 }
 0x5f2   :  { %v1526_v37 = vpop.permute.xlu1 %1525 }
 0x5f3   :  { %v1529_v38 = vsel %vm1528_vm14, %v1515_v35, %v1526_v37 }
 0x5f4   :  { %v1535_v2 = vmul.f32 %v1700_v34, %v1529_v38 }
 0x5f6   :  { %v1541_v39 = vadd.f32 %v1701_v62, %v1535_v2 }
 0x5f8   :  { %v1542_v40 = vand.u32 2147483647, %v1541_v39 }
 0x5fa   :  { %v1543_v43 = vadd.f32 1.0, %v1542_v40 }
 0x5fc   :  { %1828 = vrcp.f32 %v1543_v43 }
 0x609   :  { %v1829_v25 = vpop.eup %1828 }
 0x60a   :  { %v1545_v44 = vmul.f32 %v1829_v25, %v1541_v39 }
 0x60c   :  { %1788 = vmatmul.mubr.f32.vlgmr.msra.gmra.mxu1 %v1545_v44 }
 0x6cc   :  { %v1635_v9 = vpop.f32.mrf.mxu1 }
 0x6cd   :  { %v1636_v36 = vadd.f32 %v1702_v47, %v1635_v9 }
 0x6ce   :  { %v1789_v48 = vpop.f32.mrf.mxu1 }
 0x6cf   :  { %1640 = vst.msk [vmem:[%s2750_s10] sm:$0x3] %vm1639_vm15, %v1636_v36  ;;  %v1642_v49 = vsel %vm1641_vm0, %v1636_v36, -inf  ;;  %s1671_s10 = sshll.u32 %s1895_s9, 4  ;;  %s1672_s10 = int_to_ptr.vmem [resolvable:$true] %s1671_s10 }
 0x6d0   :  { %1643 = vmax.xlane.f32.xlu1 %v1642_v49  ;;  %s1854_s20 = scalar_lea.vmem %s1672_s10, 32  ;;  %p1859_p6 = scmp.lt.s32.totalorder %s1672_s10, %s1672_s10 }
 0x6d1   :  { %p1855_p5 = scmp.ne.s32.totalorder %s1672_s10, %s1854_s20  ;;  %p1860_p7 = scmp.lt.s32.totalorder %s1854_s20, %s1854_s20 }
 0x6d3   :  { %p1861_p8 = por %p1860_p7, %p1859_p6 }
 0x6d5   :  { %p1862_p9 = pnand %p1861_p8, %p1855_p5 }
 0x759   :  { %v1644_v51 = vpop.xlane.xlu1 %1643 }
 0x75a   :  { %v1645_v53 = vsub.f32 %v1636_v36, %v1644_v51 }
 0x75c   :  { %v1646_v54 = vmul.f32 1.442695, %v1645_v53 }
 0x75e   :  { %1830 = vpow2.f32 %v1646_v54 }
 0x76b   :  { %v1831_v55 = vpop.eup %1830 }
 0x76c   :  { %1649 = vrot.lane.b32.xlu0 %v1831_v55, %s1893_s21 }
 0x7de   :  { %v1650_v56 = vpop.permute.xlu0 %1649 }
 0x7df   :  { %v1653_v52 = vsel %vm1652_vm1, %v1650_v56, 0.0 }
 0x7e0   :  { %1654 = vadd.xlane.f32.xlu0 %v1653_v52 }
 0x869   :  { %v1655_v58 = vpop.xlane.xlu0 %1654 }
 0x86a   :  { %1832 = vrcp.f32 %v1655_v58 }
 0x877   :  { %v1833_v12 = vpop.eup %1832 }
 0x878   :  { %v1657_v59 = vmul.f32 %v1833_v12, %v1831_v55 }
 0x87a   :  { %1659 = vrot.lane.b32.xlu1 %v1657_v59, %s1893_s21 }
 0x8ec   :  { %v1660_v57 = vpop.permute.xlu1 %1659 }
 0x8ed   :  { %1662 = vst.msk [vmem:[#allocation5] sm:$0x3] %vm1652_vm1, %v1660_v57 }
 0x8ee   :  { %1865 = shalt.err (!%p1862_p9)
}
 0x8ef   :  { %1674 = dma.vmem_to_hbm [thread:$0]  %s1672_s10, 32, %s2751_s11, [#allocation4]  }
 0x8f0   :  { %1876 = dma.done.wait [#allocation4], 32  }
 0x8f1   :  { %1877 = vsyncadd [#allocation4], 4294967264 }
 0x8f2   :  { %1680 = vsyncpa [#allocation3], 1 }
 0x8f3   :  { %1681 = vsyncpa [#allocation4], 1 }

</bundles_post_ra>
